<compile_context>
chip_gen: v7x
topology: tpu7x:2x2x1
jax: 0.10.0
libtpu: 0.0.40
codegen_flags: <defaults>
</compile_context>

<pallas_src>
import math

import jax
import jax.numpy as jnp
from jax.experimental import pallas as pl
from jax.experimental.pallas import tpu as pltpu


_BITCAST_LOW_FIRST = None


def _bitcast_low_half_first():
    """True if lax.bitcast_convert_type(u32 -> bf16) puts the low 16 bits at
    trailing index 0 (probed once on-device, cached)."""
    global _BITCAST_LOW_FIRST
    if _BITCAST_LOW_FIRST is None:
        try:
            probe = jax.lax.bitcast_convert_type(
                jnp.array(0x3F80, dtype=jnp.uint32), jnp.bfloat16)
            _BITCAST_LOW_FIRST = bool(probe[0] == 1.0)   # 0x3F80 == bf16(1.0)
        except Exception:
            _BITCAST_LOW_FIRST = True
    return _BITCAST_LOW_FIRST


def _make_kernel(out_size, th, W, even_low):
    def kernel(xh_ref, xlo_ref, xcl_ref,
               w1_ref, b1_ref, mh_ref, mlo_ref, mcl_ref, by_ref,
               o_ref):
        # stage 1: 1x1 conv (+ folded BN) + ReLU, all f32, f32 accumulation.
        h = jnp.dot(w1_ref[...], xh_ref[...],
                    preferred_element_type=jnp.float32)
        h = jnp.maximum(h + b1_ref[...], 0.0)

        # stage 2: concat + PixelShuffle(2) + final 1x1 conv fused; fused
        # channel rows are ordered s*out + oc (s = 2*i + j).
        y = jnp.dot(mh_ref[...], h, preferred_element_type=jnp.float32)
        y = y + jnp.dot(mlo_ref[...], xlo_ref[...],
                        preferred_element_type=jnp.float32)
        y = y + jnp.dot(mcl_ref[...], xcl_ref[...],
                        preferred_element_type=jnp.float32)
        y = y + by_ref[...]                                   # (4*out, th*W)

        def pack(even_vals, odd_vals):
            # per-lane RNE f32 -> bf16 and pack (even, odd) column pair -> u32
            a = pltpu.bitcast(even_vals, jnp.uint32)
            b = pltpu.bitcast(odd_vals, jnp.uint32)
            a16 = (a + jnp.uint32(0x7FFF) + ((a >> 16) & jnp.uint32(1))) >> 16
            b16 = (b + jnp.uint32(0x7FFF) + ((b >> 16) & jnp.uint32(1))) >> 16
            if even_low:
                return a16 | (b16 << 16)
            return b16 | (a16 << 16)

        # s = 0,1 -> output row 2y (i=0); s = 2,3 -> output row 2y+1 (i=1)
        p_top = pack(y[0 * out_size:1 * out_size],
                     y[1 * out_size:2 * out_size])            # (out, th*W) u32
        p_bot = pack(y[2 * out_size:3 * out_size],
                     y[3 * out_size:4 * out_size])

        # row (i) interleave: scatter the packed rows into the (out, 2*th, W)
        # output block (static unroll; per-lane work only, rows independent).
        for r in range(th):
            sl = slice(r * W, (r + 1) * W)
            o_ref[:, 2 * r, :] = p_top[:, sl]
            o_ref[:, 2 * r + 1, :] = p_bot[:, sl]

    return kernel


def unet_up2_forward(high, low, cls_feat, params):
    N, Cin, H, W = high.shape
    out_size = params["w2"].shape[0]
    C_lo, C_cl = low.shape[1], cls_feat.shape[1]
    C_cat = out_size + C_lo + C_cl
    assert C_cat == 4 * out_size, \
        "pixelshuffle(2) + conv(out->out) needs 4*out_size concat channels"
    HW = H * W
    eps = 1e-5
    f32 = jnp.float32

    # ---- glue: fold BN (inference mode) into the first 1x1 conv ----
    scale = params["gamma"] / jnp.sqrt(params["var"] + eps)
    shift = params["beta"] - params["mean"] * scale
    w1f = (params["w1"] * scale[:, None]).astype(f32)              # (out, Cin)
    b1f = (params["b1"] * scale + shift).reshape(out_size, 1).astype(f32)

    # ---- glue: fused concat + PixelShuffle(2) + final conv weight ----
    # fused row index = s*out + oc, column = cat channel m:
    #   M[s*out+oc, m] = w2[oc, m//4] if m % 4 == s else 0
    row = jnp.arange(4 * out_size)
    m = jnp.arange(C_cat)
    mask = (m[None, :] % 4) == (row[:, None] // out_size)
    vals = params["w2"][(row % out_size)[:, None], m[None, :] // 4]
    MT = jnp.where(mask, vals, 0.0).astype(f32)                    # (4out, C_cat)
    MhT = MT[:, :out_size]
    MloT = MT[:, out_size:out_size + C_lo]
    MclT = MT[:, out_size + C_lo:]
    by = jnp.tile(params["b2"], 4).reshape(4 * out_size, 1).astype(f32)

    # ---- inputs: free reshape only, no wrapper cast / transpose pass ----
    xh = high.reshape(N, Cin, HW).astype(f32)
    xlo = low.reshape(N, C_lo, HW).astype(f32)
    xcl = cls_feat.reshape(N, C_cl, HW).astype(f32)

    # ---- tiling: whole rows per block, sized by bytes per VMEM generation ----
    g = math.gcd(W, 128)
    th_unit = 128 // g
    th_unit = th_unit * 4 // math.gcd(th_unit, 4)          # lcm(128//g, 4)
    try:
        info = pltpu.get_tpu_info()
        vmem_cap = int(getattr(info, "vmem_capacity_bytes", 64 * 2 ** 20))
    except Exception:
        vmem_cap = 64 * 2 ** 20
    big_vmem = vmem_cap >= 100 * 2 ** 20                    # v5e / v6e: 128 MiB
    budget = (48 if big_vmem else 20) * 2 ** 20
    vmem_limit = (96 if big_vmem else 44) * 2 ** 20

    # bytes per spatial lane: double-buffered f32 input blocks (+ one live
    # copy), double-buffered u32 output block, and the f32 h/y/packed temps.
    per_lane = (3 * 4 * (Cin + C_lo + C_cl)
                + 2 * 8 * out_size
                + 40 * out_size)
    th_budget = max(1, budget // (per_lane * W))
    th = min(th_budget, H, 128)                             # 128 = unroll cap
    th = (th // th_unit) * th_unit
    if th == 0:
        th = th_unit if th_unit < H else H
    if th >= H:
        th = H                                              # full-extent block
    # v7x: ensure >= 2 parallel grid iterations so both TensorCores get work.
    if N == 1 and th == H and H > th_unit:
        th = max(th_unit, th_unit * ((H // 2) // th_unit))

    n_rt = pl.cdiv(H, th)
    T = th * W

    kernel = _make_kernel(out_size, th, W, _bitcast_low_half_first())

    flops = 2 * N * HW * (Cin * out_size + 4 * out_size * C_cat)
    bytes_accessed = (N * HW * (Cin + C_lo + C_cl) * 4      # f32 inputs
                      + N * out_size * 2 * H * W * 4        # packed u32 output
                      + (Cin * out_size + 4 * out_size * C_cat) * 4)

    out_u32 = pl.pallas_call(
        kernel,
        out_shape=jax.ShapeDtypeStruct((N, out_size, 2 * H, W), jnp.uint32),
        grid_spec=pltpu.PrefetchScalarGridSpec(
            num_scalar_prefetch=0,
            grid=(N, n_rt),
            in_specs=[
                pl.BlockSpec((None, Cin, T), lambda n, t: (n, 0, t)),
                pl.BlockSpec((None, C_lo, T), lambda n, t: (n, 0, t)),
                pl.BlockSpec((None, C_cl, T), lambda n, t: (n, 0, t)),
                pl.BlockSpec((out_size, Cin), lambda n, t: (0, 0)),
                pl.BlockSpec((out_size, 1), lambda n, t: (0, 0)),
                pl.BlockSpec((4 * out_size, out_size), lambda n, t: (0, 0)),
                pl.BlockSpec((4 * out_size, C_lo), lambda n, t: (0, 0)),
                pl.BlockSpec((4 * out_size, C_cl), lambda n, t: (0, 0)),
                pl.BlockSpec((4 * out_size, 1), lambda n, t: (0, 0)),
            ],
            out_specs=pl.BlockSpec((None, out_size, 2 * th, W),
                                   lambda n, t: (n, 0, t, 0)),
        ),
        compiler_params=pltpu.CompilerParams(
            dimension_semantics=("parallel", "parallel"),
            vmem_limit_bytes=vmem_limit),
        cost_estimate=pl.CostEstimate(flops=flops, transcendentals=0,
                                      bytes_accessed=bytes_accessed),
    )(xh, xlo, xcl, w1f, b1f, MhT, MloT, MclT, by)

    # free views: u32 (N,out,2H,W) -> bf16 (N,out,2H,W,2) -> (N,out,2H,2W)
    out_bf16 = jax.lax.bitcast_convert_type(out_u32, jnp.bfloat16)
    return out_bf16.reshape(N, out_size, 2 * H, 2 * W)


def _reference(high, low, cls_feat, params):
    """Pure-JAX reference mirroring the PyTorch module (eval-mode BN)."""
    eps = 1e-5
    h = jnp.einsum("nchw,oc->nohw", high, params["w1"]) \
        + params["b1"][None, :, None, None]
    scale = params["gamma"] / jnp.sqrt(params["var"] + eps)
    shift = params["beta"] - params["mean"] * scale
    h = jnp.maximum(h * scale[None, :, None, None]
                    + shift[None, :, None, None], 0.0)
    cat = jnp.concatenate([h, low, cls_feat], axis=1)
    N, C, H, W = cat.shape
    r = 2
    ps = (cat.reshape(N, C // (r * r), r, r, H, W)
             .transpose(0, 1, 4, 2, 5, 3)
             .reshape(N, C // (r * r), H * r, W * r))
    return jnp.einsum("nchw,oc->nohw", ps, params["w2"]) \
        + params["b2"][None, :, None, None]


if __name__ == "__main__":
    key = jax.random.PRNGKey(0)
    N, in_size, out_size, H, W = 2, 8, 4, 16, 16
    ks = jax.random.split(key, 9)

    high = jax.random.normal(ks[0], (N, in_size, H, W), jnp.float32)
    low = jax.random.normal(ks[1], (N, 2 * out_size, H, W), jnp.float32)
    cls_feat = jax.random.normal(ks[2], (N, out_size, H, W), jnp.float32)

    params = {
        "w1": 0.1 * jax.random.normal(ks[3], (out_size, in_size), jnp.float32),
        "b1": 0.1 * jax.random.normal(ks[4], (out_size,), jnp.float32),
        "gamma": 1.0 + 0.1 * jax.random.normal(ks[5], (out_size,), jnp.float32),
        "beta": 0.1 * jax.random.normal(ks[6], (out_size,), jnp.float32),
        "mean": jnp.zeros((out_size,), jnp.float32),
        "var": jnp.ones((out_size,), jnp.float32),
        "w2": 0.1 * jax.random.normal(ks[7], (out_size, out_size), jnp.float32),
        "b2": 0.1 * jax.random.normal(ks[8], (out_size,), jnp.float32),
    }

    out = jax.block_until_ready(unet_up2_forward(high, low, cls_feat, params))
    ref = jax.block_until_ready(_reference(high, low, cls_feat, params))

    assert out.shape == (N, out_size, 2 * H, 2 * W), out.shape
    out_f32 = out.astype(jnp.float32)
    max_err = float(jnp.abs(out_f32 - ref).max())
    # f32 compute end-to-end; only the final store is bf16-rounded.
    assert jnp.allclose(out_f32, ref, atol=2e-2, rtol=2e-2), max_err
    print("KERNEL_OK")
</pallas_src>

<mosaic_0001>
module attributes {stable_mosaic.version = 11 : i64} {
  func.func @kernel(%arg0: i32, %arg1: i32, %arg2: memref<1x8x256xf32, #tpu.memory_space<vmem>>, %arg3: memref<1x8x256xf32, #tpu.memory_space<vmem>>, %arg4: memref<1x4x256xf32, #tpu.memory_space<vmem>>, %arg5: memref<4x8xf32, #tpu.memory_space<vmem>>, %arg6: memref<4x1xf32, #tpu.memory_space<vmem>>, %arg7: memref<16x4xf32, #tpu.memory_space<vmem>>, %arg8: memref<16x8xf32, #tpu.memory_space<vmem>>, %arg9: memref<16x4xf32, #tpu.memory_space<vmem>>, %arg10: memref<16x1xf32, #tpu.memory_space<vmem>>, %arg11: memref<1x4x32x16xi32, #tpu.memory_space<vmem>>) attributes {dimension_semantics = [#tpu.dimension_semantics<parallel>, #tpu.dimension_semantics<parallel>], iteration_bounds = array<i64: 2, 1>, scalar_prefetch = 0 : i64, scratch_operands = 0 : i64, tpu.core_type = #tpu.core_type<tc>, window_params = [{transform_indices = @transform_0, window_bounds = array<i64: 1, 8, 256>}, {transform_indices = @transform_1, window_bounds = array<i64: 1, 8, 256>}, {transform_indices = @transform_2, window_bounds = array<i64: 1, 4, 256>}, {pipeline_mode = #tpu.pipeline_mode<synchronous>, transform_indices = @transform_3, window_bounds = array<i64: 4, 8>}, {pipeline_mode = #tpu.pipeline_mode<synchronous>, transform_indices = @transform_4, window_bounds = array<i64: 4, 1>}, {pipeline_mode = #tpu.pipeline_mode<synchronous>, transform_indices = @transform_5, window_bounds = array<i64: 16, 4>}, {pipeline_mode = #tpu.pipeline_mode<synchronous>, transform_indices = @transform_6, window_bounds = array<i64: 16, 8>}, {pipeline_mode = #tpu.pipeline_mode<synchronous>, transform_indices = @transform_7, window_bounds = array<i64: 16, 4>}, {pipeline_mode = #tpu.pipeline_mode<synchronous>, transform_indices = @transform_8, window_bounds = array<i64: 16, 1>}, {transform_indices = @transform_9, window_bounds = array<i64: 1, 4, 32, 16>}]} {
    %c0 = arith.constant 0 : index
    %c0_0 = arith.constant 0 : index
    %0 = vector.load %arg5[%c0, %c0_0] : memref<4x8xf32, #tpu.memory_space<vmem>>, vector<4x8xf32>
    %c0_1 = arith.constant 0 : index
    %c0_2 = arith.constant 0 : index
    %c0_3 = arith.constant 0 : index
    %1 = vector.load %arg2[%c0_1, %c0_2, %c0_3] : memref<1x8x256xf32, #tpu.memory_space<vmem>>, vector<1x8x256xf32>
    %2 = vector.shape_cast %1 : vector<1x8x256xf32> to vector<8x256xf32>
    %cst = arith.constant dense<0.000000e+00> : vector<4x256xf32>
    %3 = tpu.matmul %0, %2, %cst {dimension_numbers = #tpu.dot_dimension_numbers<[1], [0], [0], [1], [0, 0, 1, 1], [], []>} : vector<4x8xf32>, vector<8x256xf32>, vector<4x256xf32> -> vector<4x256xf32>
    %c0_4 = arith.constant 0 : index
    %c0_5 = arith.constant 0 : index
    %4 = vector.load %arg6[%c0_4, %c0_5] : memref<4x1xf32, #tpu.memory_space<vmem>>, vector<4x1xf32>
    %5 = vector.broadcast %4 : vector<4x1xf32> to vector<4x256xf32>
    %6 = arith.addf %3, %5 : vector<4x256xf32>
    %cst_6 = arith.constant 0.000000e+00 : f32
    %7 = vector.broadcast %cst_6 : f32 to vector<4x256xf32>
    %8 = arith.maximumf %6, %7 : vector<4x256xf32>
    %c0_7 = arith.constant 0 : index
    %c0_8 = arith.constant 0 : index
    %9 = vector.load %arg7[%c0_7, %c0_8] : memref<16x4xf32, #tpu.memory_space<vmem>>, vector<16x4xf32>
    %cst_9 = arith.constant dense<0.000000e+00> : vector<16x256xf32>
    %10 = tpu.matmul %9, %8, %cst_9 {dimension_numbers = #tpu.dot_dimension_numbers<[1], [0], [0], [1], [0, 0, 1, 1], [], []>} : vector<16x4xf32>, vector<4x256xf32>, vector<16x256xf32> -> vector<16x256xf32>
    %c0_10 = arith.constant 0 : index
    %c0_11 = arith.constant 0 : index
    %11 = vector.load %arg8[%c0_10, %c0_11] : memref<16x8xf32, #tpu.memory_space<vmem>>, vector<16x8xf32>
    %c0_12 = arith.constant 0 : index
    %c0_13 = arith.constant 0 : index
    %c0_14 = arith.constant 0 : index
    %12 = vector.load %arg3[%c0_12, %c0_13, %c0_14] : memref<1x8x256xf32, #tpu.memory_space<vmem>>, vector<1x8x256xf32>
    %13 = vector.shape_cast %12 : vector<1x8x256xf32> to vector<8x256xf32>
    %cst_15 = arith.constant dense<0.000000e+00> : vector<16x256xf32>
    %14 = tpu.matmul %11, %13, %cst_15 {dimension_numbers = #tpu.dot_dimension_numbers<[1], [0], [0], [1], [0, 0, 1, 1], [], []>} : vector<16x8xf32>, vector<8x256xf32>, vector<16x256xf32> -> vector<16x256xf32>
    %15 = arith.addf %10, %14 : vector<16x256xf32>
    %c0_16 = arith.constant 0 : index
    %c0_17 = arith.constant 0 : index
    %16 = vector.load %arg9[%c0_16, %c0_17] : memref<16x4xf32, #tpu.memory_space<vmem>>, vector<16x4xf32>
    %c0_18 = arith.constant 0 : index
    %c0_19 = arith.constant 0 : index
    %c0_20 = arith.constant 0 : index
    %17 = vector.load %arg4[%c0_18, %c0_19, %c0_20] : memref<1x4x256xf32, #tpu.memory_space<vmem>>, vector<1x4x256xf32>
    %18 = vector.shape_cast %17 : vector<1x4x256xf32> to vector<4x256xf32>
    %cst_21 = arith.constant dense<0.000000e+00> : vector<16x256xf32>
    %19 = tpu.matmul %16, %18, %cst_21 {dimension_numbers = #tpu.dot_dimension_numbers<[1], [0], [0], [1], [0, 0, 1, 1], [], []>} : vector<16x4xf32>, vector<4x256xf32>, vector<16x256xf32> -> vector<16x256xf32>
    %20 = arith.addf %15, %19 : vector<16x256xf32>
    %c0_22 = arith.constant 0 : index
    %c0_23 = arith.constant 0 : index
    %21 = vector.load %arg10[%c0_22, %c0_23] : memref<16x1xf32, #tpu.memory_space<vmem>>, vector<16x1xf32>
    %22 = vector.broadcast %21 : vector<16x1xf32> to vector<16x256xf32>
    %23 = arith.addf %20, %22 : vector<16x256xf32>
    %24 = vector.extract_strided_slice %23 {offsets = [0, 0], sizes = [4, 256], strides = [1, 1]} : vector<16x256xf32> to vector<4x256xf32>
    %25 = vector.extract_strided_slice %23 {offsets = [4, 0], sizes = [4, 256], strides = [1, 1]} : vector<16x256xf32> to vector<4x256xf32>
    %26 = tpu.bitcast %24 : vector<4x256xf32> -> vector<4x256xi32>
    %27 = tpu.bitcast %25 : vector<4x256xf32> -> vector<4x256xi32>
    %c32767_i32 = arith.constant 32767 : i32
    %28 = vector.broadcast %c32767_i32 : i32 to vector<4x256xi32>
    %29 = arith.addi %26, %28 : vector<4x256xi32>
    %c16_i32 = arith.constant 16 : i32
    %30 = vector.broadcast %c16_i32 : i32 to vector<4x256xi32>
    %31 = arith.shrui %26, %30 : vector<4x256xi32>
    %c1_i32 = arith.constant 1 : i32
    %32 = vector.broadcast %c1_i32 : i32 to vector<4x256xi32>
    %33 = arith.andi %31, %32 : vector<4x256xi32>
    %34 = arith.addi %29, %33 : vector<4x256xi32>
    %c16_i32_24 = arith.constant 16 : i32
    %35 = vector.broadcast %c16_i32_24 : i32 to vector<4x256xi32>
    %36 = arith.shrui %34, %35 : vector<4x256xi32>
    %c32767_i32_25 = arith.constant 32767 : i32
    %37 = vector.broadcast %c32767_i32_25 : i32 to vector<4x256xi32>
    %38 = arith.addi %27, %37 : vector<4x256xi32>
    %c16_i32_26 = arith.constant 16 : i32
    %39 = vector.broadcast %c16_i32_26 : i32 to vector<4x256xi32>
    %40 = arith.shrui %27, %39 : vector<4x256xi32>
    %c1_i32_27 = arith.constant 1 : i32
    %41 = vector.broadcast %c1_i32_27 : i32 to vector<4x256xi32>
    %42 = arith.andi %40, %41 : vector<4x256xi32>
    %43 = arith.addi %38, %42 : vector<4x256xi32>
    %c16_i32_28 = arith.constant 16 : i32
    %44 = vector.broadcast %c16_i32_28 : i32 to vector<4x256xi32>
    %45 = arith.shrui %43, %44 : vector<4x256xi32>
    %c16_i32_29 = arith.constant 16 : i32
    %46 = vector.broadcast %c16_i32_29 : i32 to vector<4x256xi32>
    %47 = arith.shli %45, %46 : vector<4x256xi32>
    %48 = arith.ori %36, %47 : vector<4x256xi32>
    %49 = vector.extract_strided_slice %23 {offsets = [8, 0], sizes = [4, 256], strides = [1, 1]} : vector<16x256xf32> to vector<4x256xf32>
    %50 = vector.extract_strided_slice %23 {offsets = [12, 0], sizes = [4, 256], strides = [1, 1]} : vector<16x256xf32> to vector<4x256xf32>
    %51 = tpu.bitcast %49 : vector<4x256xf32> -> vector<4x256xi32>
    %52 = tpu.bitcast %50 : vector<4x256xf32> -> vector<4x256xi32>
    %c32767_i32_30 = arith.constant 32767 : i32
    %53 = vector.broadcast %c32767_i32_30 : i32 to vector<4x256xi32>
    %54 = arith.addi %51, %53 : vector<4x256xi32>
    %c16_i32_31 = arith.constant 16 : i32
    %55 = vector.broadcast %c16_i32_31 : i32 to vector<4x256xi32>
    %56 = arith.shrui %51, %55 : vector<4x256xi32>
    %c1_i32_32 = arith.constant 1 : i32
    %57 = vector.broadcast %c1_i32_32 : i32 to vector<4x256xi32>
    %58 = arith.andi %56, %57 : vector<4x256xi32>
    %59 = arith.addi %54, %58 : vector<4x256xi32>
    %c16_i32_33 = arith.constant 16 : i32
    %60 = vector.broadcast %c16_i32_33 : i32 to vector<4x256xi32>
    %61 = arith.shrui %59, %60 : vector<4x256xi32>
    %c32767_i32_34 = arith.constant 32767 : i32
    %62 = vector.broadcast %c32767_i32_34 : i32 to vector<4x256xi32>
    %63 = arith.addi %52, %62 : vector<4x256xi32>
    %c16_i32_35 = arith.constant 16 : i32
    %64 = vector.broadcast %c16_i32_35 : i32 to vector<4x256xi32>
    %65 = arith.shrui %52, %64 : vector<4x256xi32>
    %c1_i32_36 = arith.constant 1 : i32
    %66 = vector.broadcast %c1_i32_36 : i32 to vector<4x256xi32>
    %67 = arith.andi %65, %66 : vector<4x256xi32>
    %68 = arith.addi %63, %67 : vector<4x256xi32>
    %c16_i32_37 = arith.constant 16 : i32
    %69 = vector.broadcast %c16_i32_37 : i32 to vector<4x256xi32>
    %70 = arith.shrui %68, %69 : vector<4x256xi32>
    %c16_i32_38 = arith.constant 16 : i32
    %71 = vector.broadcast %c16_i32_38 : i32 to vector<4x256xi32>
    %72 = arith.shli %70, %71 : vector<4x256xi32>
    %73 = arith.ori %61, %72 : vector<4x256xi32>
    %74 = vector.extract_strided_slice %48 {offsets = [0, 0], sizes = [4, 16], strides = [1, 1]} : vector<4x256xi32> to vector<4x16xi32>
    %c0_39 = arith.constant 0 : index
    %c0_40 = arith.constant 0 : index
    %c0_41 = arith.constant 0 : index
    %c0_42 = arith.constant 0 : index
    %75 = vector.load %arg11[%c0_39, %c0_40, %c0_41, %c0_42] : memref<1x4x32x16xi32, #tpu.memory_space<vmem>>, vector<1x4x1x16xi32>
    %76 = vector.shape_cast %75 : vector<1x4x1x16xi32> to vector<4x16xi32>
    %77 = vector.shape_cast %74 : vector<4x16xi32> to vector<1x4x1x16xi32>
    tpu.vector_store %arg11[%c0_39, %c0_40, %c0_41, %c0_42], %77 {strides = array<i32>} : memref<1x4x32x16xi32, #tpu.memory_space<vmem>>, vector<1x4x1x16xi32>,
    %78 = vector.extract_strided_slice %73 {offsets = [0, 0], sizes = [4, 16], strides = [1, 1]} : vector<4x256xi32> to vector<4x16xi32>
    %c0_43 = arith.constant 0 : index
    %c0_44 = arith.constant 0 : index
    %c1 = arith.constant 1 : index
    %c0_45 = arith.constant 0 : index
    %79 = vector.load %arg11[%c0_43, %c0_44, %c1, %c0_45] : memref<1x4x32x16xi32, #tpu.memory_space<vmem>>, vector<1x4x1x16xi32>
    %80 = vector.shape_cast %79 : vector<1x4x1x16xi32> to vector<4x16xi32>
    %81 = vector.shape_cast %78 : vector<4x16xi32> to vector<1x4x1x16xi32>
    tpu.vector_store %arg11[%c0_43, %c0_44, %c1, %c0_45], %81 {strides = array<i32>} : memref<1x4x32x16xi32, #tpu.memory_space<vmem>>, vector<1x4x1x16xi32>,
    %82 = vector.extract_strided_slice %48 {offsets = [0, 16], sizes = [4, 16], strides = [1, 1]} : vector<4x256xi32> to vector<4x16xi32>
    %c0_46 = arith.constant 0 : index
    %c0_47 = arith.constant 0 : index
    %c2 = arith.constant 2 : index
    %c0_48 = arith.constant 0 : index
    %83 = vector.load %arg11[%c0_46, %c0_47, %c2, %c0_48] : memref<1x4x32x16xi32, #tpu.memory_space<vmem>>, vector<1x4x1x16xi32>
    %84 = vector.shape_cast %83 : vector<1x4x1x16xi32> to vector<4x16xi32>
    %85 = vector.shape_cast %82 : vector<4x16xi32> to vector<1x4x1x16xi32>
    tpu.vector_store %arg11[%c0_46, %c0_47, %c2, %c0_48], %85 {strides = array<i32>} : memref<1x4x32x16xi32, #tpu.memory_space<vmem>>, vector<1x4x1x16xi32>,
    %86 = vector.extract_strided_slice %73 {offsets = [0, 16], sizes = [4, 16], strides = [1, 1]} : vector<4x256xi32> to vector<4x16xi32>
    %c0_49 = arith.constant 0 : index
    %c0_50 = arith.constant 0 : index
    %c3 = arith.constant 3 : index
    %c0_51 = arith.constant 0 : index
    %87 = vector.load %arg11[%c0_49, %c0_50, %c3, %c0_51] : memref<1x4x32x16xi32, #tpu.memory_space<vmem>>, vector<1x4x1x16xi32>
    %88 = vector.shape_cast %87 : vector<1x4x1x16xi32> to vector<4x16xi32>
    %89 = vector.shape_cast %86 : vector<4x16xi32> to vector<1x4x1x16xi32>
    tpu.vector_store %arg11[%c0_49, %c0_50, %c3, %c0_51], %89 {strides = array<i32>} : memref<1x4x32x16xi32, #tpu.memory_space<vmem>>, vector<1x4x1x16xi32>,
    %90 = vector.extract_strided_slice %48 {offsets = [0, 32], sizes = [4, 16], strides = [1, 1]} : vector<4x256xi32> to vector<4x16xi32>
    %c0_52 = arith.constant 0 : index
    %c0_53 = arith.constant 0 : index
    %c4 = arith.constant 4 : index
    %c0_54 = arith.constant 0 : index
    %91 = vector.load %arg11[%c0_52, %c0_53, %c4, %c0_54] : memref<1x4x32x16xi32, #tpu.memory_space<vmem>>, vector<1x4x1x16xi32>
    %92 = vector.shape_cast %91 : vector<1x4x1x16xi32> to vector<4x16xi32>
    %93 = vector.shape_cast %90 : vector<4x16xi32> to vector<1x4x1x16xi32>
    tpu.vector_store %arg11[%c0_52, %c0_53, %c4, %c0_54], %93 {strides = array<i32>} : memref<1x4x32x16xi32, #tpu.memory_space<vmem>>, vector<1x4x1x16xi32>,
    %94 = vector.extract_strided_slice %73 {offsets = [0, 32], sizes = [4, 16], strides = [1, 1]} : vector<4x256xi32> to vector<4x16xi32>
    %c0_55 = arith.constant 0 : index
    %c0_56 = arith.constant 0 : index
    %c5 = arith.constant 5 : index
    %c0_57 = arith.constant 0 : index
    %95 = vector.load %arg11[%c0_55, %c0_56, %c5, %c0_57] : memref<1x4x32x16xi32, #tpu.memory_space<vmem>>, vector<1x4x1x16xi32>
    %96 = vector.shape_cast %95 : vector<1x4x1x16xi32> to vector<4x16xi32>
    %97 = vector.shape_cast %94 : vector<4x16xi32> to vector<1x4x1x16xi32>
    tpu.vector_store %arg11[%c0_55, %c0_56, %c5, %c0_57], %97 {strides = array<i32>} : memref<1x4x32x16xi32, #tpu.memory_space<vmem>>, vector<1x4x1x16xi32>,
    %98 = vector.extract_strided_slice %48 {offsets = [0, 48], sizes = [4, 16], strides = [1, 1]} : vector<4x256xi32> to vector<4x16xi32>
    %c0_58 = arith.constant 0 : index
    %c0_59 = arith.constant 0 : index
    %c6 = arith.constant 6 : index
    %c0_60 = arith.constant 0 : index
    %99 = vector.load %arg11[%c0_58, %c0_59, %c6, %c0_60] : memref<1x4x32x16xi32, #tpu.memory_space<vmem>>, vector<1x4x1x16xi32>
    %100 = vector.shape_cast %99 : vector<1x4x1x16xi32> to vector<4x16xi32>
    %101 = vector.shape_cast %98 : vector<4x16xi32> to vector<1x4x1x16xi32>
    tpu.vector_store %arg11[%c0_58, %c0_59, %c6, %c0_60], %101 {strides = array<i32>} : memref<1x4x32x16xi32, #tpu.memory_space<vmem>>, vector<1x4x1x16xi32>,
    %102 = vector.extract_strided_slice %73 {offsets = [0, 48], sizes = [4, 16], strides = [1, 1]} : vector<4x256xi32> to vector<4x16xi32>
    %c0_61 = arith.constant 0 : index
    %c0_62 = arith.constant 0 : index
    %c7 = arith.constant 7 : index
    %c0_63 = arith.constant 0 : index
    %103 = vector.load %arg11[%c0_61, %c0_62, %c7, %c0_63] : memref<1x4x32x16xi32, #tpu.memory_space<vmem>>, vector<1x4x1x16xi32>
    %104 = vector.shape_cast %103 : vector<1x4x1x16xi32> to vector<4x16xi32>
    %105 = vector.shape_cast %102 : vector<4x16xi32> to vector<1x4x1x16xi32>
    tpu.vector_store %arg11[%c0_61, %c0_62, %c7, %c0_63], %105 {strides = array<i32>} : memref<1x4x32x16xi32, #tpu.memory_space<vmem>>, vector<1x4x1x16xi32>,
    %106 = vector.extract_strided_slice %48 {offsets = [0, 64], sizes = [4, 16], strides = [1, 1]} : vector<4x256xi32> to vector<4x16xi32>
    %c0_64 = arith.constant 0 : index
    %c0_65 = arith.constant 0 : index
    %c8 = arith.constant 8 : index
    %c0_66 = arith.constant 0 : index
    %107 = vector.load %arg11[%c0_64, %c0_65, %c8, %c0_66] : memref<1x4x32x16xi32, #tpu.memory_space<vmem>>, vector<1x4x1x16xi32>
    %108 = vector.shape_cast %107 : vector<1x4x1x16xi32> to vector<4x16xi32>
    %109 = vector.shape_cast %106 : vector<4x16xi32> to vector<1x4x1x16xi32>
    tpu.vector_store %arg11[%c0_64, %c0_65, %c8, %c0_66], %109 {strides = array<i32>} : memref<1x4x32x16xi32, #tpu.memory_space<vmem>>, vector<1x4x1x16xi32>,
    %110 = vector.extract_strided_slice %73 {offsets = [0, 64], sizes = [4, 16], strides = [1, 1]} : vector<4x256xi32> to vector<4x16xi32>
    %c0_67 = arith.constant 0 : index
    %c0_68 = arith.constant 0 : index
    %c9 = arith.constant 9 : index
    %c0_69 = arith.constant 0 : index
    %111 = vector.load %arg11[%c0_67, %c0_68, %c9, %c0_69] : memref<1x4x32x16xi32, #tpu.memory_space<vmem>>, vector<1x4x1x16xi32>
    %112 = vector.shape_cast %111 : vector<1x4x1x16xi32> to vector<4x16xi32>
    %113 = vector.shape_cast %110 : vector<4x16xi32> to vector<1x4x1x16xi32>
    tpu.vector_store %arg11[%c0_67, %c0_68, %c9, %c0_69], %113 {strides = array<i32>} : memref<1x4x32x16xi32, #tpu.memory_space<vmem>>, vector<1x4x1x16xi32>,
    %114 = vector.extract_strided_slice %48 {offsets = [0, 80], sizes = [4, 16], strides = [1, 1]} : vector<4x256xi32> to vector<4x16xi32>
    %c0_70 = arith.constant 0 : index
    %c0_71 = arith.constant 0 : index
    %c10 = arith.constant 10 : index
    %c0_72 = arith.constant 0 : index
    %115 = vector.load %arg11[%c0_70, %c0_71, %c10, %c0_72] : memref<1x4x32x16xi32, #tpu.memory_space<vmem>>, vector<1x4x1x16xi32>
    %116 = vector.shape_cast %115 : vector<1x4x1x16xi32> to vector<4x16xi32>
    %117 = vector.shape_cast %114 : vector<4x16xi32> to vector<1x4x1x16xi32>
    tpu.vector_store %arg11[%c0_70, %c0_71, %c10, %c0_72], %117 {strides = array<i32>} : memref<1x4x32x16xi32, #tpu.memory_space<vmem>>, vector<1x4x1x16xi32>,
    %118 = vector.extract_strided_slice %73 {offsets = [0, 80], sizes = [4, 16], strides = [1, 1]} : vector<4x256xi32> to vector<4x16xi32>
    %c0_73 = arith.constant 0 : index
    %c0_74 = arith.constant 0 : index
    %c11 = arith.constant 11 : index
    %c0_75 = arith.constant 0 : index
    %119 = vector.load %arg11[%c0_73, %c0_74, %c11, %c0_75] : memref<1x4x32x16xi32, #tpu.memory_space<vmem>>, vector<1x4x1x16xi32>
    %120 = vector.shape_cast %119 : vector<1x4x1x16xi32> to vector<4x16xi32>
    %121 = vector.shape_cast %118 : vector<4x16xi32> to vector<1x4x1x16xi32>
    tpu.vector_store %arg11[%c0_73, %c0_74, %c11, %c0_75], %121 {strides = array<i32>} : memref<1x4x32x16xi32, #tpu.memory_space<vmem>>, vector<1x4x1x16xi32>,
    %122 = vector.extract_strided_slice %48 {offsets = [0, 96], sizes = [4, 16], strides = [1, 1]} : vector<4x256xi32> to vector<4x16xi32>
    %c0_76 = arith.constant 0 : index
    %c0_77 = arith.constant 0 : index
    %c12 = arith.constant 12 : index
    %c0_78 = arith.constant 0 : index
    %123 = vector.load %arg11[%c0_76, %c0_77, %c12, %c0_78] : memref<1x4x32x16xi32, #tpu.memory_space<vmem>>, vector<1x4x1x16xi32>
    %124 = vector.shape_cast %123 : vector<1x4x1x16xi32> to vector<4x16xi32>
    %125 = vector.shape_cast %122 : vector<4x16xi32> to vector<1x4x1x16xi32>
    tpu.vector_store %arg11[%c0_76, %c0_77, %c12, %c0_78], %125 {strides = array<i32>} : memref<1x4x32x16xi32, #tpu.memory_space<vmem>>, vector<1x4x1x16xi32>,
    %126 = vector.extract_strided_slice %73 {offsets = [0, 96], sizes = [4, 16], strides = [1, 1]} : vector<4x256xi32> to vector<4x16xi32>
    %c0_79 = arith.constant 0 : index
    %c0_80 = arith.constant 0 : index
    %c13 = arith.constant 13 : index
    %c0_81 = arith.constant 0 : index
    %127 = vector.load %arg11[%c0_79, %c0_80, %c13, %c0_81] : memref<1x4x32x16xi32, #tpu.memory_space<vmem>>, vector<1x4x1x16xi32>
    %128 = vector.shape_cast %127 : vector<1x4x1x16xi32> to vector<4x16xi32>
    %129 = vector.shape_cast %126 : vector<4x16xi32> to vector<1x4x1x16xi32>
    tpu.vector_store %arg11[%c0_79, %c0_80, %c13, %c0_81], %129 {strides = array<i32>} : memref<1x4x32x16xi32, #tpu.memory_space<vmem>>, vector<1x4x1x16xi32>,
    %130 = vector.extract_strided_slice %48 {offsets = [0, 112], sizes = [4, 16], strides = [1, 1]} : vector<4x256xi32> to vector<4x16xi32>
    %c0_82 = arith.constant 0 : index
    %c0_83 = arith.constant 0 : index
    %c14 = arith.constant 14 : index
    %c0_84 = arith.constant 0 : index
    %131 = vector.load %arg11[%c0_82, %c0_83, %c14, %c0_84] : memref<1x4x32x16xi32, #tpu.memory_space<vmem>>, vector<1x4x1x16xi32>
    %132 = vector.shape_cast %131 : vector<1x4x1x16xi32> to vector<4x16xi32>
    %133 = vector.shape_cast %130 : vector<4x16xi32> to vector<1x4x1x16xi32>
    tpu.vector_store %arg11[%c0_82, %c0_83, %c14, %c0_84], %133 {strides = array<i32>} : memref<1x4x32x16xi32, #tpu.memory_space<vmem>>, vector<1x4x1x16xi32>,
    %134 = vector.extract_strided_slice %73 {offsets = [0, 112], sizes = [4, 16], strides = [1, 1]} : vector<4x256xi32> to vector<4x16xi32>
    %c0_85 = arith.constant 0 : index
    %c0_86 = arith.constant 0 : index
    %c15 = arith.constant 15 : index
    %c0_87 = arith.constant 0 : index
    %135 = vector.load %arg11[%c0_85, %c0_86, %c15, %c0_87] : memref<1x4x32x16xi32, #tpu.memory_space<vmem>>, vector<1x4x1x16xi32>
    %136 = vector.shape_cast %135 : vector<1x4x1x16xi32> to vector<4x16xi32>
    %137 = vector.shape_cast %134 : vector<4x16xi32> to vector<1x4x1x16xi32>
    tpu.vector_store %arg11[%c0_85, %c0_86, %c15, %c0_87], %137 {strides = array<i32>} : memref<1x4x32x16xi32, #tpu.memory_space<vmem>>, vector<1x4x1x16xi32>,
    %138 = vector.extract_strided_slice %48 {offsets = [0, 128], sizes = [4, 16], strides = [1, 1]} : vector<4x256xi32> to vector<4x16xi32>
    %c0_88 = arith.constant 0 : index
    %c0_89 = arith.constant 0 : index
    %c16 = arith.constant 16 : index
    %c0_90 = arith.constant 0 : index
    %139 = vector.load %arg11[%c0_88, %c0_89, %c16, %c0_90] : memref<1x4x32x16xi32, #tpu.memory_space<vmem>>, vector<1x4x1x16xi32>
    %140 = vector.shape_cast %139 : vector<1x4x1x16xi32> to vector<4x16xi32>
    %141 = vector.shape_cast %138 : vector<4x16xi32> to vector<1x4x1x16xi32>
    tpu.vector_store %arg11[%c0_88, %c0_89, %c16, %c0_90], %141 {strides = array<i32>} : memref<1x4x32x16xi32, #tpu.memory_space<vmem>>, vector<1x4x1x16xi32>,
    %142 = vector.extract_strided_slice %73 {offsets = [0, 128], sizes = [4, 16], strides = [1, 1]} : vector<4x256xi32> to vector<4x16xi32>
    %c0_91 = arith.constant 0 : index
    %c0_92 = arith.constant 0 : index
    %c17 = arith.constant 17 : index
    %c0_93 = arith.constant 0 : index
    %143 = vector.load %arg11[%c0_91, %c0_92, %c17, %c0_93] : memref<1x4x32x16xi32, #tpu.memory_space<vmem>>, vector<1x4x1x16xi32>
    %144 = vector.shape_cast %143 : vector<1x4x1x16xi32> to vector<4x16xi32>
    %145 = vector.shape_cast %142 : vector<4x16xi32> to vector<1x4x1x16xi32>
    tpu.vector_store %arg11[%c0_91, %c0_92, %c17, %c0_93], %145 {strides = array<i32>} : memref<1x4x32x16xi32, #tpu.memory_space<vmem>>, vector<1x4x1x16xi32>,
    %146 = vector.extract_strided_slice %48 {offsets = [0, 144], sizes = [4, 16], strides = [1, 1]} : vector<4x256xi32> to vector<4x16xi32>
    %c0_94 = arith.constant 0 : index
    %c0_95 = arith.constant 0 : index
    %c18 = arith.constant 18 : index
    %c0_96 = arith.constant 0 : index
    %147 = vector.load %arg11[%c0_94, %c0_95, %c18, %c0_96] : memref<1x4x32x16xi32, #tpu.memory_space<vmem>>, vector<1x4x1x16xi32>
    %148 = vector.shape_cast %147 : vector<1x4x1x16xi32> to vector<4x16xi32>
    %149 = vector.shape_cast %146 : vector<4x16xi32> to vector<1x4x1x16xi32>
    tpu.vector_store %arg11[%c0_94, %c0_95, %c18, %c0_96], %149 {strides = array<i32>} : memref<1x4x32x16xi32, #tpu.memory_space<vmem>>, vector<1x4x1x16xi32>,
    %150 = vector.extract_strided_slice %73 {offsets = [0, 144], sizes = [4, 16], strides = [1, 1]} : vector<4x256xi32> to vector<4x16xi32>
    %c0_97 = arith.constant 0 : index
    %c0_98 = arith.constant 0 : index
    %c19 = arith.constant 19 : index
    %c0_99 = arith.constant 0 : index
    %151 = vector.load %arg11[%c0_97, %c0_98, %c19, %c0_99] : memref<1x4x32x16xi32, #tpu.memory_space<vmem>>, vector<1x4x1x16xi32>
    %152 = vector.shape_cast %151 : vector<1x4x1x16xi32> to vector<4x16xi32>
    %153 = vector.shape_cast %150 : vector<4x16xi32> to vector<1x4x1x16xi32>
    tpu.vector_store %arg11[%c0_97, %c0_98, %c19, %c0_99], %153 {strides = array<i32>} : memref<1x4x32x16xi32, #tpu.memory_space<vmem>>, vector<1x4x1x16xi32>,
    %154 = vector.extract_strided_slice %48 {offsets = [0, 160], sizes = [4, 16], strides = [1, 1]} : vector<4x256xi32> to vector<4x16xi32>
    %c0_100 = arith.constant 0 : index
    %c0_101 = arith.constant 0 : index
    %c20 = arith.constant 20 : index
    %c0_102 = arith.constant 0 : index
    %155 = vector.load %arg11[%c0_100, %c0_101, %c20, %c0_102] : memref<1x4x32x16xi32, #tpu.memory_space<vmem>>, vector<1x4x1x16xi32>
    %156 = vector.shape_cast %155 : vector<1x4x1x16xi32> to vector<4x16xi32>
    %157 = vector.shape_cast %154 : vector<4x16xi32> to vector<1x4x1x16xi32>
    tpu.vector_store %arg11[%c0_100, %c0_101, %c20, %c0_102], %157 {strides = array<i32>} : memref<1x4x32x16xi32, #tpu.memory_space<vmem>>, vector<1x4x1x16xi32>,
    %158 = vector.extract_strided_slice %73 {offsets = [0, 160], sizes = [4, 16], strides = [1, 1]} : vector<4x256xi32> to vector<4x16xi32>
    %c0_103 = arith.constant 0 : index
    %c0_104 = arith.constant 0 : index
    %c21 = arith.constant 21 : index
    %c0_105 = arith.constant 0 : index
    %159 = vector.load %arg11[%c0_103, %c0_104, %c21, %c0_105] : memref<1x4x32x16xi32, #tpu.memory_space<vmem>>, vector<1x4x1x16xi32>
    %160 = vector.shape_cast %159 : vector<1x4x1x16xi32> to vector<4x16xi32>
    %161 = vector.shape_cast %158 : vector<4x16xi32> to vector<1x4x1x16xi32>
    tpu.vector_store %arg11[%c0_103, %c0_104, %c21, %c0_105], %161 {strides = array<i32>} : memref<1x4x32x16xi32, #tpu.memory_space<vmem>>, vector<1x4x1x16xi32>,
    %162 = vector.extract_strided_slice %48 {offsets = [0, 176], sizes = [4, 16], strides = [1, 1]} : vector<4x256xi32> to vector<4x16xi32>
    %c0_106 = arith.constant 0 : index
    %c0_107 = arith.constant 0 : index
    %c22 = arith.constant 22 : index
    %c0_108 = arith.constant 0 : index
    %163 = vector.load %arg11[%c0_106, %c0_107, %c22, %c0_108] : memref<1x4x32x16xi32, #tpu.memory_space<vmem>>, vector<1x4x1x16xi32>
    %164 = vector.shape_cast %163 : vector<1x4x1x16xi32> to vector<4x16xi32>
    %165 = vector.shape_cast %162 : vector<4x16xi32> to vector<1x4x1x16xi32>
    tpu.vector_store %arg11[%c0_106, %c0_107, %c22, %c0_108], %165 {strides = array<i32>} : memref<1x4x32x16xi32, #tpu.memory_space<vmem>>, vector<1x4x1x16xi32>,
    %166 = vector.extract_strided_slice %73 {offsets = [0, 176], sizes = [4, 16], strides = [1, 1]} : vector<4x256xi32> to vector<4x16xi32>
    %c0_109 = arith.constant 0 : index
    %c0_110 = arith.constant 0 : index
    %c23 = arith.constant 23 : index
    %c0_111 = arith.constant 0 : index
    %167 = vector.load %arg11[%c0_109, %c0_110, %c23, %c0_111] : memref<1x4x32x16xi32, #tpu.memory_space<vmem>>, vector<1x4x1x16xi32>
    %168 = vector.shape_cast %167 : vector<1x4x1x16xi32> to vector<4x16xi32>
    %169 = vector.shape_cast %166 : vector<4x16xi32> to vector<1x4x1x16xi32>
    tpu.vector_store %arg11[%c0_109, %c0_110, %c23, %c0_111], %169 {strides = array<i32>} : memref<1x4x32x16xi32, #tpu.memory_space<vmem>>, vector<1x4x1x16xi32>,
    %170 = vector.extract_strided_slice %48 {offsets = [0, 192], sizes = [4, 16], strides = [1, 1]} : vector<4x256xi32> to vector<4x16xi32>
    %c0_112 = arith.constant 0 : index
    %c0_113 = arith.constant 0 : index
    %c24 = arith.constant 24 : index
    %c0_114 = arith.constant 0 : index
    %171 = vector.load %arg11[%c0_112, %c0_113, %c24, %c0_114] : memref<1x4x32x16xi32, #tpu.memory_space<vmem>>, vector<1x4x1x16xi32>
    %172 = vector.shape_cast %171 : vector<1x4x1x16xi32> to vector<4x16xi32>
    %173 = vector.shape_cast %170 : vector<4x16xi32> to vector<1x4x1x16xi32>
    tpu.vector_store %arg11[%c0_112, %c0_113, %c24, %c0_114], %173 {strides = array<i32>} : memref<1x4x32x16xi32, #tpu.memory_space<vmem>>, vector<1x4x1x16xi32>,
    %174 = vector.extract_strided_slice %73 {offsets = [0, 192], sizes = [4, 16], strides = [1, 1]} : vector<4x256xi32> to vector<4x16xi32>
    %c0_115 = arith.constant 0 : index
    %c0_116 = arith.constant 0 : index
    %c25 = arith.constant 25 : index
    %c0_117 = arith.constant 0 : index
    %175 = vector.load %arg11[%c0_115, %c0_116, %c25, %c0_117] : memref<1x4x32x16xi32, #tpu.memory_space<vmem>>, vector<1x4x1x16xi32>
    %176 = vector.shape_cast %175 : vector<1x4x1x16xi32> to vector<4x16xi32>
    %177 = vector.shape_cast %174 : vector<4x16xi32> to vector<1x4x1x16xi32>
    tpu.vector_store %arg11[%c0_115, %c0_116, %c25, %c0_117], %177 {strides = array<i32>} : memref<1x4x32x16xi32, #tpu.memory_space<vmem>>, vector<1x4x1x16xi32>,
    %178 = vector.extract_strided_slice %48 {offsets = [0, 208], sizes = [4, 16], strides = [1, 1]} : vector<4x256xi32> to vector<4x16xi32>
    %c0_118 = arith.constant 0 : index
    %c0_119 = arith.constant 0 : index
    %c26 = arith.constant 26 : index
    %c0_120 = arith.constant 0 : index
    %179 = vector.load %arg11[%c0_118, %c0_119, %c26, %c0_120] : memref<1x4x32x16xi32, #tpu.memory_space<vmem>>, vector<1x4x1x16xi32>
    %180 = vector.shape_cast %179 : vector<1x4x1x16xi32> to vector<4x16xi32>
    %181 = vector.shape_cast %178 : vector<4x16xi32> to vector<1x4x1x16xi32>
    tpu.vector_store %arg11[%c0_118, %c0_119, %c26, %c0_120], %181 {strides = array<i32>} : memref<1x4x32x16xi32, #tpu.memory_space<vmem>>, vector<1x4x1x16xi32>,
    %182 = vector.extract_strided_slice %73 {offsets = [0, 208], sizes = [4, 16], strides = [1, 1]} : vector<4x256xi32> to vector<4x16xi32>
    %c0_121 = arith.constant 0 : index
    %c0_122 = arith.constant 0 : index
    %c27 = arith.constant 27 : index
    %c0_123 = arith.constant 0 : index
    %183 = vector.load %arg11[%c0_121, %c0_122, %c27, %c0_123] : memref<1x4x32x16xi32, #tpu.memory_space<vmem>>, vector<1x4x1x16xi32>
    %184 = vector.shape_cast %183 : vector<1x4x1x16xi32> to vector<4x16xi32>
    %185 = vector.shape_cast %182 : vector<4x16xi32> to vector<1x4x1x16xi32>
    tpu.vector_store %arg11[%c0_121, %c0_122, %c27, %c0_123], %185 {strides = array<i32>} : memref<1x4x32x16xi32, #tpu.memory_space<vmem>>, vector<1x4x1x16xi32>,
    %186 = vector.extract_strided_slice %48 {offsets = [0, 224], sizes = [4, 16], strides = [1, 1]} : vector<4x256xi32> to vector<4x16xi32>
    %c0_124 = arith.constant 0 : index
    %c0_125 = arith.constant 0 : index
    %c28 = arith.constant 28 : index
    %c0_126 = arith.constant 0 : index
    %187 = vector.load %arg11[%c0_124, %c0_125, %c28, %c0_126] : memref<1x4x32x16xi32, #tpu.memory_space<vmem>>, vector<1x4x1x16xi32>
    %188 = vector.shape_cast %187 : vector<1x4x1x16xi32> to vector<4x16xi32>
    %189 = vector.shape_cast %186 : vector<4x16xi32> to vector<1x4x1x16xi32>
    tpu.vector_store %arg11[%c0_124, %c0_125, %c28, %c0_126], %189 {strides = array<i32>} : memref<1x4x32x16xi32, #tpu.memory_space<vmem>>, vector<1x4x1x16xi32>,
    %190 = vector.extract_strided_slice %73 {offsets = [0, 224], sizes = [4, 16], strides = [1, 1]} : vector<4x256xi32> to vector<4x16xi32>
    %c0_127 = arith.constant 0 : index
    %c0_128 = arith.constant 0 : index
    %c29 = arith.constant 29 : index
    %c0_129 = arith.constant 0 : index
    %191 = vector.load %arg11[%c0_127, %c0_128, %c29, %c0_129] : memref<1x4x32x16xi32, #tpu.memory_space<vmem>>, vector<1x4x1x16xi32>
    %192 = vector.shape_cast %191 : vector<1x4x1x16xi32> to vector<4x16xi32>
    %193 = vector.shape_cast %190 : vector<4x16xi32> to vector<1x4x1x16xi32>
    tpu.vector_store %arg11[%c0_127, %c0_128, %c29, %c0_129], %193 {strides = array<i32>} : memref<1x4x32x16xi32, #tpu.memory_space<vmem>>, vector<1x4x1x16xi32>,
    %194 = vector.extract_strided_slice %48 {offsets = [0, 240], sizes = [4, 16], strides = [1, 1]} : vector<4x256xi32> to vector<4x16xi32>
    %c0_130 = arith.constant 0 : index
    %c0_131 = arith.constant 0 : index
    %c30 = arith.constant 30 : index
    %c0_132 = arith.constant 0 : index
    %195 = vector.load %arg11[%c0_130, %c0_131, %c30, %c0_132] : memref<1x4x32x16xi32, #tpu.memory_space<vmem>>, vector<1x4x1x16xi32>
    %196 = vector.shape_cast %195 : vector<1x4x1x16xi32> to vector<4x16xi32>
    %197 = vector.shape_cast %194 : vector<4x16xi32> to vector<1x4x1x16xi32>
    tpu.vector_store %arg11[%c0_130, %c0_131, %c30, %c0_132], %197 {strides = array<i32>} : memref<1x4x32x16xi32, #tpu.memory_space<vmem>>, vector<1x4x1x16xi32>,
    %198 = vector.extract_strided_slice %73 {offsets = [0, 240], sizes = [4, 16], strides = [1, 1]} : vector<4x256xi32> to vector<4x16xi32>
    %c0_133 = arith.constant 0 : index
    %c0_134 = arith.constant 0 : index
    %c31 = arith.constant 31 : index
    %c0_135 = arith.constant 0 : index
    %199 = vector.load %arg11[%c0_133, %c0_134, %c31, %c0_135] : memref<1x4x32x16xi32, #tpu.memory_space<vmem>>, vector<1x4x1x16xi32>
    %200 = vector.shape_cast %199 : vector<1x4x1x16xi32> to vector<4x16xi32>
    %201 = vector.shape_cast %198 : vector<4x16xi32> to vector<1x4x1x16xi32>
    tpu.vector_store %arg11[%c0_133, %c0_134, %c31, %c0_135], %201 {strides = array<i32>} : memref<1x4x32x16xi32, #tpu.memory_space<vmem>>, vector<1x4x1x16xi32>,
    return
  }
  func.func @transform_0(%arg0: i32, %arg1: i32) -> (i32, i32, i32) {
    %c0_i32 = arith.constant 0 : i32
    %c0_i32_0 = arith.constant 0 : i32
    return %arg0, %c0_i32, %arg1 : i32, i32, i32
  }
  func.func @transform_1(%arg0: i32, %arg1: i32) -> (i32, i32, i32) {
    %c0_i32 = arith.constant 0 : i32
    %c0_i32_0 = arith.constant 0 : i32
    return %arg0, %c0_i32, %arg1 : i32, i32, i32
  }
  func.func @transform_2(%arg0: i32, %arg1: i32) -> (i32, i32, i32) {
    %c0_i32 = arith.constant 0 : i32
    %c0_i32_0 = arith.constant 0 : i32
    return %arg0, %c0_i32, %arg1 : i32, i32, i32
  }
  func.func @transform_3(%arg0: i32, %arg1: i32) -> (i32, i32) {
    %c0_i32 = arith.constant 0 : i32
    %c0_i32_0 = arith.constant 0 : i32
    %c0_i32_1 = arith.constant 0 : i32
    return %c0_i32, %c0_i32_0 : i32, i32
  }
  func.func @transform_4(%arg0: i32, %arg1: i32) -> (i32, i32) {
    %c0_i32 = arith.constant 0 : i32
    %c0_i32_0 = arith.constant 0 : i32
    %c0_i32_1 = arith.constant 0 : i32
    return %c0_i32, %c0_i32_0 : i32, i32
  }
  func.func @transform_5(%arg0: i32, %arg1: i32) -> (i32, i32) {
    %c0_i32 = arith.constant 0 : i32
    %c0_i32_0 = arith.constant 0 : i32
    %c0_i32_1 = arith.constant 0 : i32
    return %c0_i32, %c0_i32_0 : i32, i32
  }
  func.func @transform_6(%arg0: i32, %arg1: i32) -> (i32, i32) {
    %c0_i32 = arith.constant 0 : i32
    %c0_i32_0 = arith.constant 0 : i32
    %c0_i32_1 = arith.constant 0 : i32
    return %c0_i32, %c0_i32_0 : i32, i32
  }
  func.func @transform_7(%arg0: i32, %arg1: i32) -> (i32, i32) {
    %c0_i32 = arith.constant 0 : i32
    %c0_i32_0 = arith.constant 0 : i32
    %c0_i32_1 = arith.constant 0 : i32
    return %c0_i32, %c0_i32_0 : i32, i32
  }
  func.func @transform_8(%arg0: i32, %arg1: i32) -> (i32, i32) {
    %c0_i32 = arith.constant 0 : i32
    %c0_i32_0 = arith.constant 0 : i32
    %c0_i32_1 = arith.constant 0 : i32
    return %c0_i32, %c0_i32_0 : i32, i32
  }
  func.func @transform_9(%arg0: i32, %arg1: i32) -> (i32, i32, i32, i32) {
    %c0_i32 = arith.constant 0 : i32
    %c0_i32_0 = arith.constant 0 : i32
    %c0_i32_1 = arith.constant 0 : i32
    return %arg0, %c0_i32, %arg1, %c0_i32_0 : i32, i32, i32, i32
  }
}

</mosaic_0001>

<bundles_post_ra>
// kernel: tpu_custom_call.1
= control target key start
LH: loop header
LB: loop body
LE: loop exit
PB: predicated region body
PF: predicated region fallthrough
CT: control target
= control target key end

     0   :  { %s1653_s30 = smov 0   ;;  %s1655_s10 = smov 0   ;;  %s2225_s0 = inlined_call_operand.vmem [shape: f32[2,8,256], index: 0, kind: input, shape index: {}]   ;;  %s2226_s1 = inlined_call_operand.vmem [shape: f32[2,8,256], index: 1, kind: input, shape index: {}]   ;;  %s2227_s2 = inlined_call_operand.vmem [shape: f32[2,4,256], index: 2, kind: input, shape index: {}]   ;;  %s2228_s3 = inlined_call_operand.vmem [shape: f32[4,8], index: 3, kind: input, shape index: {}]   ;;  %s2229_s4 = inlined_call_operand.vmem [shape: f32[4,1], index: 4, kind: input, shape index: {}]   ;;  %s2230_s5 = inlined_call_operand.vmem [shape: f32[16,4], index: 5, kind: input, shape index: {}]   ;;  %s2231_s6 = inlined_call_operand.vmem [shape: f32[16,8], index: 6, kind: input, shape index: {}]   ;;  %s2232_s7 = inlined_call_operand.vmem [shape: f32[16,4], index: 7, kind: input, shape index: {}]   ;;  %s2233_s8 = inlined_call_operand.vmem [shape: f32[16,1], index: 8, kind: input, shape index: {}]   ;;  %s2234_s9 = inlined_call_operand.vmem [shape: u32[2,4,32,16], index: 9, kind: output, shape index: {}]  }
   0x1   :  { %s1657_s11 = smov 0  }
   0x2 LB: > { %s31_s12 = sadd.s32 1, %s1587_s10  ;;  %p1498_p0 = scmp.ge.s32.totalorder %s1591_s11, 1  ;;  %s1591_s11 = sphi %s1657_s11, %s19_s11   ;;  %s1587_s10 = sphi %s1655_s10, %s2236_s10   ;;  %s1583_s30 = sphi %s1653_s30, %s2235_s30  }
   0x3   : > { %p33_p1 = scmp.ge.s32.totalorder %s31_s12, 2  ;;  %p342_p2 = scmp.lt.s32.totalorder %s1591_s11, 3 }
   0x5   : > { %s2238_s12 = smov (%p33_p1, %s31_s12), 0  ;;  %p343_p3 = pnand %p1498_p0, %p342_p2 }
   0x6   : > { %p405_p4 = scmp.lt.s32.totalorder (!%p343_p3), %s1583_s30, 1  ;;  %v1593_v0 = vmov (!%p343_p3), 0.0   ;;  %v1594_v1 = vmov (!%p343_p3), 0   ;;  %v447_v2 = vld [vmem:[%s2229_s4] sm:$0xf] (!%p343_p3)  ;;  %vm453_vm0 = vcmask (!%p343_p3), 64512   ;;  %v861_v47 = vlaneseq (!%p343_p3) }
   0x7   : > { %346 = sbr.rel (%p343_p3) target bundleno = 821 (0x335), region = 56  ;;  %521 = vmatprep.mubr.f32.mxu0 (!%p343_p3), %v1593_v0  ;;  %1566 = vset.pattern.permute.xlu0 (!%p343_p3), %v1594_v1  ;;  %v806_v3 = vld [vmem:[%s2233_s8] sm:$0xff] (!%p343_p3)  ;;  %v533_v10 = vld [vmem:[%s2231_s6 + $0x8] sm:$0xff] (!%p343_p3)  ;;  %vm626_vm1 = vcmask (!%p343_p3), 1043456   ;;  %vm619_vm2 = vcmask (!%p343_p3), 31744   ;;  %vm882_vm3 = vcmask (!%p343_p3), 122880  }
   0x8   : > { %450 = vperm.xlu0 (!%p343_p3), %1566, %v447_v2   ;;  %697 = vmatprep.mubr.f32.mxu1 (!%p343_p3), %v1593_v0  ;;  %v444_v6 = vld [vmem:[%s2228_s3] sm:$0xf] (!%p343_p3)  ;;  %v807_v11 = vld [vmem:[%s2233_s8 + $0x8] sm:$0xff] (!%p343_p3)  ;;  %v1595_v41 = vmov (!%p343_p3), 1966171168   ;;  %v862_v58 = vshrl.u32 (!%p343_p3), %v861_v47, 7 }
   0x9   : > { %1567 = vset.pattern.permute.xlu1 (!%p343_p3), %v1594_v1  ;;  %v532_v9 = vld [vmem:[%s2231_s6] sm:$0xff] (!%p343_p3)  ;;  %v531_v22 = vld [vmem:[%s2230_s5 + $0x8] sm:$0xff] (!%p343_p3)  ;;  %v859_v42 = vunpack.c.l.s4 (!%p343_p3), %v1595_v41  ;;  %s1597_s14 = smov (!%p343_p3), 96   ;;  %s1599_s16 = smov (!%p343_p3), 64  }
   0xa   : > { %815 = vperm.xlu1 (!%p343_p3), %1567, %v807_v11   ;;  %v530_v21 = vld [vmem:[%s2230_s5] sm:$0xff] (!%p343_p3)  ;;  %v711_v24 = vld [vmem:[%s2232_s7 + $0x8] sm:$0xff] (!%p343_p3)  ;;  %s1602_s19 = smov (!%p343_p3), 16  }
   0xb   : > { %v710_v23 = vld [vmem:[%s2232_s7] sm:$0xff] (!%p343_p3)  ;;  %v860_v54 = vunpack.c.0.s8 (!%p343_p3), %v859_v42 }
   0xc   : > { %810 = vperm.xlu0 (!%p343_p3), %1566, %v806_v3  }
   0xe   : > { %s2240_s30 = smov (!%p405_p4, %s1583_s30), 1 }
   0xf   : > { %s1520_s17 = sshll.u32 %s2240_s30, 4  ;;  %s1522_s15 = sshll.u32 %s2240_s30, 3 }
  0x10   : > { %s412_s20 = scalar_lea.vmem %s2225_s0, %s1520_s17  ;;  %s422_s25 = scalar_lea.vmem %s2226_s1, %s1520_s17 }
  0x11   : > { %v446_v4 = vld [vmem:[%s412_s20 + $0x8] sm:$0xff]  ;;  %v445_v5 = vld [vmem:[%s412_s20] sm:$0xff]  ;;  %s432_s18 = scalar_lea.vmem %s2227_s2, %s1522_s15  ;;  %s1523_s27 = sshll.u32 %s2240_s30, 7 }
  0x12   : > { %457 = vmatprep.subr.mxu0 %v446_v4  ;;  %v535_v7 = vld [vmem:[%s422_s25 + $0x8] sm:$0xff]  ;;  %v534_v8 = vld [vmem:[%s422_s25] sm:$0xff]  ;;  %s1720_s13 = scalar_lea.vmem %s2234_s9, %s1523_s27  ;;  %s1596_s30 = smov 112  }
  0x13   : > { %458 = vmatpush1.msra.mxu0 %v445_v5  ;;  %v712_v16 = vld [vmem:[%s432_s18] sm:$0xff]  ;;  %v863_v5 = vsub.s32 %v860_v54, %v862_v58  ;;  %s1598_s15 = smov 80   ;;  %s1600_s17 = smov 48  }
  0x14   : > { %1507 = vmatmul.mubr.msk.f32.vlgmr.msra.gmra.mrb[0].mxu0 %vm453_vm0, %v444_v6  ;;  %542 = vmatprep.subr.mxu0 %v535_v7  ;;  %v714_v19 = vcombine.high %v712_v16, %v712_v16  ;;  %s1601_s18 = smov 32  }
  0x15   : > { %606 = vmatprep.mubr.f32.mxu0 %v1593_v0  ;;  %543 = vmatpush1.msra.mxu0 %v534_v8 }
  0x18   : > { %1508 = vmatmul.mubr.msk.f32.vlgmr.msra.gmra.mrb[2].mxu0 %vm453_vm0, %v532_v9 }
  0x19   : > { %612 = vmatprep.mubr.f32.mxu0 %v1593_v0 }
  0x1c   : > { %1509 = vmatmul.mubr.msk.f32.gmra.mrb[4].mxu0 %vm453_vm0, %v533_v10 }
  0x87   : > { %v451_v12 = vpop.permute.xlu0 %450 }
  0x89   : > { %v816_v37 = vpop.permute.xlu1 %815 }
  0x8b   : > { %v811_v32 = vpop.permute.xlu0 %810 }
  0xe7   : > { %v523_v13 = vpop.f32.mrb[0].mxu0 }
  0xe8   : > { %v524_v14 = vadd.f32 %v523_v13, %v451_v12  ;;  %v525_v15 = vpop.f32.mrb[1].mxu0 }
  0xe9   : > { %v526_v17 = vadd.f32 %v525_v15, %v451_v12 }
  0xea   : > { %v528_v20 = vmax.f32 %v524_v14, 0.0  ;;  %v1715_v14 = vsub.s32 0, %v862_v58 }
  0xeb   : > { %v529_v18 = vmax.f32 %v526_v17, 0.0  ;;  %v608_v25 = vpop.f32.mrb[2].mxu0 }
  0xec   : > { %v610_v26 = vpop.f32.mrb[3].mxu0 }
  0xed   : > { %1510 = vmatprep.subr.msk.mxu1 %vm626_vm1, %v529_v18 }
  0xee   : > { %1511 = vmatpush1.msk.msra.mxu1 %vm626_vm1, %v528_v20 }
  0xef   : > { %1512 = vmatmul.mubr.msk.f32.vlgmr.msra.gmra.mrb[0].mxu1 %vm619_vm2, %v530_v21  ;;  %1514 = vmatprep.subr.msk.mxu1 %vm626_vm1, %v714_v19  ;;  %v614_v27 = vpop.f32.mrb[4].mxu0 }
  0xf0   : > { %1515 = vmatpush1.msk.msra.mxu1 %vm626_vm1, %v712_v16  ;;  %703 = vmatprep.mubr.f32.mxu1 %v1593_v0  ;;  %v616_v28 = vpop.f32.mrb[5].mxu0 }
  0xf3   : > { %1513 = vmatmul.mubr.msk.f32.gmra.mrb[2].mxu1 %vm619_vm2, %v531_v22 }
  0xf4   : > { %789 = vmatprep.mubr.f32.mxu1 %v1593_v0 }
  0xf7   : > { %1516 = vmatmul.mubr.msk.f32.vlgmr.msra.gmra.mrb[0].mxu1 %vm619_vm2, %v710_v23 }
  0xf8   : > { %795 = vmatprep.mubr.f32.mxu1 %v1593_v0 }
  0xfb   : > { %1517 = vmatmul.mubr.msk.f32.gmra.mrb[2].mxu1 %vm619_vm2, %v711_v24 }
 0x1ca   : > { %v791_v29 = vpop.f32.mrb[0].mxu1 }
 0x1cb   : > { %v1524_v30 = vadd.f32 %v791_v29, %v608_v25  ;;  %v793_v31 = vpop.f32.mrb[1].mxu1 }
 0x1cc   : > { %v1525_v33 = vadd.f32 %v793_v31, %v610_v26 }
 0x1cd   : > { %v818_v34 = vadd.f32 %v1524_v30, %v811_v32 }
 0x1ce   : > { %v819_v35 = vadd.f32 %v1525_v33, %v811_v32  ;;  %v797_v36 = vpop.f32.mrb[2].mxu1 }
 0x1cf   : > { %v826_v38 = vshrl.u32 %v818_v34, 16  ;;  %v1526_v39 = vadd.f32 %v797_v36, %v614_v27  ;;  %v799_v40 = vpop.f32.mrb[3].mxu1  ;;  %v824_v45 = vadd.s32 32767, %v818_v34 }
 0x1d0   : > { %v827_v43 = vshrl.u32 %v819_v35, 16  ;;  %v1527_v44 = vadd.f32 %v799_v40, %v616_v28  ;;  %v825_v49 = vadd.s32 32767, %v819_v35 }
 0x1d1   : > { %v828_v46 = vand.u32 1, %v826_v38  ;;  %v820_v48 = vadd.f32 %v1526_v39, %v816_v37 }
 0x1d2   : > { %v829_v50 = vand.u32 1, %v827_v43  ;;  %v821_v51 = vadd.f32 %v1527_v44, %v816_v37 }
 0x1d3   : > { %v830_v52 = vadd.s32 %v828_v46, %v824_v45  ;;  %v844_v53 = vshrl.u32 %v820_v48, 16  ;;  %v842_v59 = vadd.s32 32767, %v820_v48 }
 0x1d4   : > { %v831_v55 = vadd.s32 %v829_v50, %v825_v49  ;;  %v845_v56 = vshrl.u32 %v821_v51, 16  ;;  %v843_v62 = vadd.s32 32767, %v821_v51 }
 0x1d5   : > { %v832_v57 = vshrl.u32 %v830_v52, 16  ;;  %v846_v60 = vand.u32 1, %v844_v53 }
 0x1d6   : > { %v833_v61 = vshrl.u32 %v831_v55, 16  ;;  %v847_v63 = vand.u32 1, %v845_v56 }
 0x1d7   : > { %v834_v0 = vshll.u32 %v832_v57, 16  ;;  %v848_v1 = vadd.s32 %v846_v60, %v842_v59 }
 0x1d8   : > { %v835_v2 = vshll.u32 %v833_v61, 16  ;;  %v849_v3 = vadd.s32 %v847_v63, %v843_v62 }
 0x1d9   : > { %v836_v4 = vrot.slane %v834_v0, 4  ;;  %v850_v6 = vshrl.u32 %v848_v1, 16 }
 0x1da   : > { %v837_v7 = vrot.slane %v835_v2, 4  ;;  %v851_v8 = vshrl.u32 %v849_v3, 16 }
 0x1db   : > { %v838_v9 = vor.u32 %v836_v4, %v832_v57  ;;  %v852_v10 = vshll.u32 %v850_v6, 16 }
 0x1dc   : > { %v839_v11 = vor.u32 %v837_v7, %v833_v61  ;;  %v853_v12 = vshll.u32 %v851_v8, 16 }
 0x1dd   : > { %v864_v13 = vrot.slane %v838_v9, %v863_v5  ;;  %v854_v15 = vrot.slane %v852_v10, 4 }
 0x1de   : > { %v1121_v16 = vrot.slane %v839_v11, %v863_v5  ;;  %v855_v17 = vrot.slane %v853_v12, 4 }
 0x1df   : > { %v865_v18 = vcombine.high %v864_v13, %v864_v13  ;;  %v872_v19 = vrot.slane %v864_v13, %v863_v5  ;;  %v856_v20 = vor.u32 %v854_v15, %v850_v6 }
 0x1e0   : > { %v1122_v21 = vcombine.high %v1121_v16, %v1121_v16  ;;  %v1722_v22 = vrot.slane %v1121_v16, %v863_v5  ;;  %v857_v23 = vor.u32 %v855_v17, %v851_v8 }
 0x1e1   : > { %v879_v24 = vrot.slane %v865_v18, %v863_v5  ;;  %v1724_v25 = vcombine.high %v872_v19, %v872_v19  ;;  %883 = vst.msk [vmem:[%s1720_s13] sm:$0x1] %vm882_vm3, %v872_v19  ;;  %v918_v26 = vrot.slane %v872_v19, %v1715_v14  ;;  %v893_v27 = vrot.slane %v856_v20, %v863_v5 }
 0x1e2   : > { %v1729_v28 = vrot.slane %v1122_v21, %v863_v5  ;;  %v1137_v29 = vcombine.high %v1722_v22, %v1722_v22  ;;  %1139 = vst.msk [vmem:[%s1720_s13 + $0x10] sm:$0x1] %vm882_vm3, %v1722_v22  ;;  %v1149_v30 = vrot.slane %v857_v23, %v863_v5  ;;  %v1174_v54 = vrot.slane %v1722_v22, %v1715_v14 }
 0x1e3   : > { %v1736_v31 = vcombine.high %v879_v24, %v879_v24  ;;  %884 = vst.msk [vmem:[%s1720_s13 + $0x20] sm:$0x1] %vm882_vm3, %v879_v24  ;;  %885 = vst.msk [vmem:[%s1720_s13 + $0x40] sm:$0x1] %vm882_vm3, %v1724_v25  ;;  %v922_v32 = vrot.slane %v879_v24, %v1715_v14  ;;  %v894_v33 = vcombine.high %v893_v27, %v893_v27  ;;  %931 = vrot.lane.b32.xlu1 %v918_v26, %s1596_s30 }
 0x1e4   : > { %v1138_v34 = vcombine.high %v1729_v28, %v1729_v28  ;;  %1140 = vst.msk [vmem:[%s1720_s13 + $0x30] sm:$0x1] %vm882_vm3, %v1729_v28  ;;  %1141 = vst.msk [vmem:[%s1720_s13 + $0x50] sm:$0x1] %vm882_vm3, %v1137_v29  ;;  %v1753_v35 = vrot.slane %v1137_v29, %v1715_v14  ;;  %v901_v36 = vrot.slane %v893_v27, %v863_v5 }
 0x1e5   : > { %886 = vst.msk [vmem:[%s1720_s13 + $0x60] sm:$0x1] %vm882_vm3, %v1736_v31  ;;  %v908_v37 = vrot.slane %v894_v33, %v863_v5  ;;  %v1150_v38 = vcombine.high %v1149_v30, %v1149_v30  ;;  %v1157_v39 = vrot.slane %v1149_v30, %v863_v5  ;;  %933 = vrot.lane.b32.xlu0 %v922_v32, %s1596_s30 }
 0x1e6   : > { %1142 = vst.msk [vmem:[%s1720_s13 + $0x70] sm:$0x1] %vm882_vm3, %v1138_v34  ;;  %v1762_v40 = vrot.slane %v1138_v34, %v1715_v14  ;;  %v909_v41 = vcombine.high %v901_v36, %v901_v36  ;;  %911 = vst.msk [vmem:[%s1720_s13 + $0x1] sm:$0x1] %vm882_vm3, %v901_v36  ;;  %v1767_v42 = vrot.slane %v901_v36, %v1715_v14 }
 0x1e7   : > { %v910_v43 = vcombine.high %v908_v37, %v908_v37  ;;  %912 = vst.msk [vmem:[%s1720_s13 + $0x21] sm:$0x1] %vm882_vm3, %v908_v37  ;;  %v1772_v44 = vrot.slane %v908_v37, %v1715_v14  ;;  %v1164_v45 = vrot.slane %v1150_v38, %v863_v5  ;;  %v1165_v46 = vcombine.high %v1157_v39, %v1157_v39 }
 0x1e8   : > { %1167 = vst.msk [vmem:[%s1720_s13 + $0x11] sm:$0x1] %vm882_vm3, %v1157_v39  ;;  %971 = vrot.lane.b32.xlu1 %v918_v26, %s1597_s14  ;;  %913 = vst.msk [vmem:[%s1720_s13 + $0x41] sm:$0x1] %vm882_vm3, %v909_v41  ;;  %v1780_v47 = vrot.slane %v909_v41, %v1715_v14  ;;  %v1783_v48 = vrot.slane %v1157_v39, %v1715_v14  ;;  %v1178_v55 = vrot.slane %v1729_v28, %v1715_v14 }
 0x1e9   : > { %914 = vst.msk [vmem:[%s1720_s13 + $0x61] sm:$0x1] %vm882_vm3, %v910_v43  ;;  %v1788_v49 = vrot.slane %v910_v43, %v1715_v14  ;;  %v1166_v50 = vcombine.high %v1164_v45, %v1164_v45  ;;  %1168 = vst.msk [vmem:[%s1720_s13 + $0x31] sm:$0x1] %vm882_vm3, %v1164_v45  ;;  %v1795_v51 = vrot.slane %v1164_v45, %v1715_v14  ;;  %973 = vrot.lane.b32.xlu0 %v922_v32, %s1597_s14 }
 0x1ea   : > { %1169 = vst.msk [vmem:[%s1720_s13 + $0x51] sm:$0x1] %vm882_vm3, %v1165_v46  ;;  %v1798_v52 = vrot.slane %v1165_v46, %v1715_v14  ;;  %v926_v56 = vrot.slane %v1724_v25, %v1715_v14  ;;  %v930_v57 = vrot.slane %v1736_v31, %v1715_v14 }
 0x1eb   : > { %1170 = vst.msk [vmem:[%s1720_s13 + $0x71] sm:$0x1] %vm882_vm3, %v1166_v50  ;;  %v1804_v53 = vrot.slane %v1166_v50, %v1715_v14 }
 0x1ec   : > { %995 = vrot.lane.b32.xlu1 %v918_v26, %s1598_s15 }
 0x1ed   : > { %997 = vrot.lane.b32.xlu0 %v922_v32, %s1598_s15 }
 0x1f0   : > { %1019 = vrot.lane.b32.xlu1 %v918_v26, %s1599_s16 }
 0x1f1   : > { %1021 = vrot.lane.b32.xlu0 %v922_v32, %s1599_s16 }
 0x1f4   : > { %1043 = vrot.lane.b32.xlu1 %v918_v26, %s1600_s17 }
 0x1f5   : > { %1045 = vrot.lane.b32.xlu0 %v922_v32, %s1600_s17 }
 0x1f8   : > { %1067 = vrot.lane.b32.xlu1 %v918_v26, %s1601_s18 }
 0x1f9   : > { %1069 = vrot.lane.b32.xlu0 %v922_v32, %s1601_s18 }
 0x1fc   : > { %1091 = vrot.lane.b32.xlu1 %v918_v26, %s1602_s19 }
 0x1fd   : > { %1093 = vrot.lane.b32.xlu0 %v922_v32, %s1602_s19 }
 0x200   : > { %1187 = vrot.lane.b32.xlu1 %v1174_v54, %s1596_s30 }
 0x201   : > { %1189 = vrot.lane.b32.xlu0 %v1178_v55, %s1596_s30 }
 0x204   : > { %1227 = vrot.lane.b32.xlu1 %v1174_v54, %s1597_s14 }
 0x205   : > { %1229 = vrot.lane.b32.xlu0 %v1178_v55, %s1597_s14 }
 0x208   : > { %1251 = vrot.lane.b32.xlu1 %v1174_v54, %s1598_s15 }
 0x209   : > { %1253 = vrot.lane.b32.xlu0 %v1178_v55, %s1598_s15 }
 0x20c   : > { %1275 = vrot.lane.b32.xlu1 %v1174_v54, %s1599_s16 }
 0x20d   : > { %1277 = vrot.lane.b32.xlu0 %v1178_v55, %s1599_s16 }
 0x210   : > { %1299 = vrot.lane.b32.xlu1 %v1174_v54, %s1600_s17 }
 0x211   : > { %1301 = vrot.lane.b32.xlu0 %v1178_v55, %s1600_s17 }
 0x214   : > { %1323 = vrot.lane.b32.xlu1 %v1174_v54, %s1601_s18 }
 0x215   : > { %1325 = vrot.lane.b32.xlu0 %v1178_v55, %s1601_s18 }
 0x218   : > { %1347 = vrot.lane.b32.xlu1 %v1174_v54, %s1602_s19 }
 0x219   : > { %1349 = vrot.lane.b32.xlu0 %v1178_v55, %s1602_s19 }
 0x21c   : > { %935 = vrot.lane.b32.xlu1 %v926_v56, %s1596_s30 }
 0x21d   : > { %937 = vrot.lane.b32.xlu0 %v930_v57, %s1596_s30 }
 0x220   : > { %975 = vrot.lane.b32.xlu1 %v926_v56, %s1597_s14 }
 0x221   : > { %977 = vrot.lane.b32.xlu0 %v930_v57, %s1597_s14 }
 0x224   : > { %999 = vrot.lane.b32.xlu1 %v926_v56, %s1598_s15 }
 0x225   : > { %1001 = vrot.lane.b32.xlu0 %v930_v57, %s1598_s15 }
 0x228   : > { %1023 = vrot.lane.b32.xlu1 %v926_v56, %s1599_s16 }
 0x229   : > { %1025 = vrot.lane.b32.xlu0 %v930_v57, %s1599_s16 }
 0x22c   : > { %1047 = vrot.lane.b32.xlu1 %v926_v56, %s1600_s17 }
 0x22d   : > { %1049 = vrot.lane.b32.xlu0 %v930_v57, %s1600_s17 }
 0x230   : > { %1071 = vrot.lane.b32.xlu1 %v926_v56, %s1601_s18 }
 0x231   : > { %1073 = vrot.lane.b32.xlu0 %v930_v57, %s1601_s18 }
 0x234   : > { %1095 = vrot.lane.b32.xlu1 %v926_v56, %s1602_s19 }
 0x235   : > { %1097 = vrot.lane.b32.xlu0 %v930_v57, %s1602_s19 }
 0x238   : > { %1191 = vrot.lane.b32.xlu1 %v1753_v35, %s1596_s30 }
 0x239   : > { %1193 = vrot.lane.b32.xlu0 %v1762_v40, %s1596_s30 }
 0x23c   : > { %1231 = vrot.lane.b32.xlu1 %v1753_v35, %s1597_s14 }
 0x23d   : > { %1233 = vrot.lane.b32.xlu0 %v1762_v40, %s1597_s14 }
 0x240   : > { %1255 = vrot.lane.b32.xlu1 %v1753_v35, %s1598_s15 }
 0x241   : > { %1257 = vrot.lane.b32.xlu0 %v1762_v40, %s1598_s15 }
 0x244   : > { %1279 = vrot.lane.b32.xlu1 %v1753_v35, %s1599_s16 }
 0x245   : > { %1281 = vrot.lane.b32.xlu0 %v1762_v40, %s1599_s16 }
 0x248   : > { %1303 = vrot.lane.b32.xlu1 %v1753_v35, %s1600_s17 }
 0x249   : > { %1305 = vrot.lane.b32.xlu0 %v1762_v40, %s1600_s17 }
 0x24c   : > { %1327 = vrot.lane.b32.xlu1 %v1753_v35, %s1601_s18 }
 0x24d   : > { %1329 = vrot.lane.b32.xlu0 %v1762_v40, %s1601_s18 }
 0x250   : > { %1351 = vrot.lane.b32.xlu1 %v1753_v35, %s1602_s19 }
 0x251   : > { %1353 = vrot.lane.b32.xlu0 %v1762_v40, %s1602_s19 }
 0x254   : > { %959 = vrot.lane.b32.xlu1 %v1767_v42, %s1596_s30 }
 0x255   : > { %v932_v58 = vpop.permute.xlu1 %931  ;;  %961 = vrot.lane.b32.xlu0 %v1772_v44, %s1596_s30 }
 0x256   : > { %939 = vst.msk [vmem:[%s1720_s13 + $0x2] sm:$0x1] %vm882_vm3, %v932_v58 }
 0x257   : > { %v934_v59 = vpop.permute.xlu0 %933 }
 0x258   : > { %983 = vrot.lane.b32.xlu1 %v1767_v42, %s1597_s14  ;;  %940 = vst.msk [vmem:[%s1720_s13 + $0x22] sm:$0x1] %vm882_vm3, %v934_v59 }
 0x259   : > { %985 = vrot.lane.b32.xlu0 %v1772_v44, %s1597_s14 }
 0x25a   : > { %v972_v60 = vpop.permute.xlu1 %971 }
 0x25b   : > { %979 = vst.msk [vmem:[%s1720_s13 + $0x4] sm:$0x1] %vm882_vm3, %v972_v60  ;;  %v974_v61 = vpop.permute.xlu0 %973 }
 0x25c   : > { %1007 = vrot.lane.b32.xlu1 %v1767_v42, %s1598_s15  ;;  %980 = vst.msk [vmem:[%s1720_s13 + $0x24] sm:$0x1] %vm882_vm3, %v974_v61 }
 0x25d   : > { %1009 = vrot.lane.b32.xlu0 %v1772_v44, %s1598_s15 }
 0x25e   : > { %v996_v62 = vpop.permute.xlu1 %995 }
 0x25f   : > { %1003 = vst.msk [vmem:[%s1720_s13 + $0x6] sm:$0x1] %vm882_vm3, %v996_v62  ;;  %v998_v63 = vpop.permute.xlu0 %997 }
 0x260   : > { %1031 = vrot.lane.b32.xlu1 %v1767_v42, %s1599_s16  ;;  %1004 = vst.msk [vmem:[%s1720_s13 + $0x26] sm:$0x1] %vm882_vm3, %v998_v63 }
 0x261   : > { %1033 = vrot.lane.b32.xlu0 %v1772_v44, %s1599_s16 }
 0x262   : > { %v1020_v0 = vpop.permute.xlu1 %1019 }
 0x263   : > { %1027 = vst.msk [vmem:[%s1720_s13 + $0x8] sm:$0x1] %vm882_vm3, %v1020_v0  ;;  %v1022_v1 = vpop.permute.xlu0 %1021 }
 0x264   : > { %1055 = vrot.lane.b32.xlu1 %v1767_v42, %s1600_s17  ;;  %1028 = vst.msk [vmem:[%s1720_s13 + $0x28] sm:$0x1] %vm882_vm3, %v1022_v1 }
 0x265   : > { %1057 = vrot.lane.b32.xlu0 %v1772_v44, %s1600_s17 }
 0x266   : > { %v1044_v2 = vpop.permute.xlu1 %1043 }
 0x267   : > { %1051 = vst.msk [vmem:[%s1720_s13 + $0xa] sm:$0x1] %vm882_vm3, %v1044_v2  ;;  %v1046_v3 = vpop.permute.xlu0 %1045 }
 0x268   : > { %1079 = vrot.lane.b32.xlu1 %v1767_v42, %s1601_s18  ;;  %1052 = vst.msk [vmem:[%s1720_s13 + $0x2a] sm:$0x1] %vm882_vm3, %v1046_v3 }
 0x269   : > { %1081 = vrot.lane.b32.xlu0 %v1772_v44, %s1601_s18 }
 0x26a   : > { %v1068_v4 = vpop.permute.xlu1 %1067 }
 0x26b   : > { %1075 = vst.msk [vmem:[%s1720_s13 + $0xc] sm:$0x1] %vm882_vm3, %v1068_v4  ;;  %v1070_v5 = vpop.permute.xlu0 %1069 }
 0x26c   : > { %1103 = vrot.lane.b32.xlu1 %v1767_v42, %s1602_s19  ;;  %1076 = vst.msk [vmem:[%s1720_s13 + $0x2c] sm:$0x1] %vm882_vm3, %v1070_v5 }
 0x26d   : > { %1105 = vrot.lane.b32.xlu0 %v1772_v44, %s1602_s19 }
 0x26e   : > { %v1092_v6 = vpop.permute.xlu1 %1091 }
 0x26f   : > { %1099 = vst.msk [vmem:[%s1720_s13 + $0xe] sm:$0x1] %vm882_vm3, %v1092_v6  ;;  %v1094_v7 = vpop.permute.xlu0 %1093 }
 0x270   : > { %1215 = vrot.lane.b32.xlu1 %v1783_v48, %s1596_s30  ;;  %1100 = vst.msk [vmem:[%s1720_s13 + $0x2e] sm:$0x1] %vm882_vm3, %v1094_v7 }
 0x271   : > { %1217 = vrot.lane.b32.xlu0 %v1795_v51, %s1596_s30 }
 0x272   : > { %v1188_v8 = vpop.permute.xlu1 %1187 }
 0x273   : > { %1195 = vst.msk [vmem:[%s1720_s13 + $0x12] sm:$0x1] %vm882_vm3, %v1188_v8  ;;  %v1190_v9 = vpop.permute.xlu0 %1189 }
 0x274   : > { %1239 = vrot.lane.b32.xlu1 %v1783_v48, %s1597_s14  ;;  %1196 = vst.msk [vmem:[%s1720_s13 + $0x32] sm:$0x1] %vm882_vm3, %v1190_v9 }
 0x275   : > { %1241 = vrot.lane.b32.xlu0 %v1795_v51, %s1597_s14 }
 0x276   : > { %v1228_v10 = vpop.permute.xlu1 %1227 }
 0x277   : > { %1235 = vst.msk [vmem:[%s1720_s13 + $0x14] sm:$0x1] %vm882_vm3, %v1228_v10  ;;  %v1230_v11 = vpop.permute.xlu0 %1229 }
 0x278   : > { %1263 = vrot.lane.b32.xlu1 %v1783_v48, %s1598_s15  ;;  %1236 = vst.msk [vmem:[%s1720_s13 + $0x34] sm:$0x1] %vm882_vm3, %v1230_v11 }
 0x279   : > { %1265 = vrot.lane.b32.xlu0 %v1795_v51, %s1598_s15 }
 0x27a   : > { %v1252_v12 = vpop.permute.xlu1 %1251 }
 0x27b   : > { %1259 = vst.msk [vmem:[%s1720_s13 + $0x16] sm:$0x1] %vm882_vm3, %v1252_v12  ;;  %v1254_v13 = vpop.permute.xlu0 %1253 }
 0x27c   : > { %1287 = vrot.lane.b32.xlu1 %v1783_v48, %s1599_s16  ;;  %1260 = vst.msk [vmem:[%s1720_s13 + $0x36] sm:$0x1] %vm882_vm3, %v1254_v13 }
 0x27d   : > { %1289 = vrot.lane.b32.xlu0 %v1795_v51, %s1599_s16 }
 0x27e   : > { %v1276_v14 = vpop.permute.xlu1 %1275 }
 0x27f   : > { %1283 = vst.msk [vmem:[%s1720_s13 + $0x18] sm:$0x1] %vm882_vm3, %v1276_v14  ;;  %v1278_v15 = vpop.permute.xlu0 %1277 }
 0x280   : > { %1311 = vrot.lane.b32.xlu1 %v1783_v48, %s1600_s17  ;;  %1284 = vst.msk [vmem:[%s1720_s13 + $0x38] sm:$0x1] %vm882_vm3, %v1278_v15 }
 0x281   : > { %1313 = vrot.lane.b32.xlu0 %v1795_v51, %s1600_s17 }
 0x282   : > { %v1300_v16 = vpop.permute.xlu1 %1299 }
 0x283   : > { %1307 = vst.msk [vmem:[%s1720_s13 + $0x1a] sm:$0x1] %vm882_vm3, %v1300_v16  ;;  %v1302_v17 = vpop.permute.xlu0 %1301 }
 0x284   : > { %1335 = vrot.lane.b32.xlu1 %v1783_v48, %s1601_s18  ;;  %1308 = vst.msk [vmem:[%s1720_s13 + $0x3a] sm:$0x1] %vm882_vm3, %v1302_v17 }
 0x285   : > { %1337 = vrot.lane.b32.xlu0 %v1795_v51, %s1601_s18 }
 0x286   : > { %v1324_v18 = vpop.permute.xlu1 %1323 }
 0x287   : > { %1331 = vst.msk [vmem:[%s1720_s13 + $0x1c] sm:$0x1] %vm882_vm3, %v1324_v18  ;;  %v1326_v19 = vpop.permute.xlu0 %1325 }
 0x288   : > { %1359 = vrot.lane.b32.xlu1 %v1783_v48, %s1602_s19  ;;  %1332 = vst.msk [vmem:[%s1720_s13 + $0x3c] sm:$0x1] %vm882_vm3, %v1326_v19 }
 0x289   : > { %1361 = vrot.lane.b32.xlu0 %v1795_v51, %s1602_s19 }
 0x28a   : > { %v1348_v20 = vpop.permute.xlu1 %1347 }
 0x28b   : > { %1355 = vst.msk [vmem:[%s1720_s13 + $0x1e] sm:$0x1] %vm882_vm3, %v1348_v20  ;;  %v1350_v21 = vpop.permute.xlu0 %1349 }
 0x28c   : > { %963 = vrot.lane.b32.xlu1 %v1780_v47, %s1596_s30  ;;  %1356 = vst.msk [vmem:[%s1720_s13 + $0x3e] sm:$0x1] %vm882_vm3, %v1350_v21 }
 0x28d   : > { %965 = vrot.lane.b32.xlu0 %v1788_v49, %s1596_s30 }
 0x28e   : > { %v936_v22 = vpop.permute.xlu1 %935 }
 0x28f   : > { %941 = vst.msk [vmem:[%s1720_s13 + $0x42] sm:$0x1] %vm882_vm3, %v936_v22  ;;  %v938_v23 = vpop.permute.xlu0 %937 }
 0x290   : > { %987 = vrot.lane.b32.xlu1 %v1780_v47, %s1597_s14  ;;  %942 = vst.msk [vmem:[%s1720_s13 + $0x62] sm:$0x1] %vm882_vm3, %v938_v23 }
 0x291   : > { %989 = vrot.lane.b32.xlu0 %v1788_v49, %s1597_s14 }
 0x292   : > { %v976_v24 = vpop.permute.xlu1 %975 }
 0x293   : > { %981 = vst.msk [vmem:[%s1720_s13 + $0x44] sm:$0x1] %vm882_vm3, %v976_v24  ;;  %v978_v25 = vpop.permute.xlu0 %977 }
 0x294   : > { %1011 = vrot.lane.b32.xlu1 %v1780_v47, %s1598_s15  ;;  %982 = vst.msk [vmem:[%s1720_s13 + $0x64] sm:$0x1] %vm882_vm3, %v978_v25 }
 0x295   : > { %1013 = vrot.lane.b32.xlu0 %v1788_v49, %s1598_s15 }
 0x296   : > { %v1000_v26 = vpop.permute.xlu1 %999 }
 0x297   : > { %1005 = vst.msk [vmem:[%s1720_s13 + $0x46] sm:$0x1] %vm882_vm3, %v1000_v26  ;;  %v1002_v27 = vpop.permute.xlu0 %1001 }
 0x298   : > { %1035 = vrot.lane.b32.xlu1 %v1780_v47, %s1599_s16  ;;  %1006 = vst.msk [vmem:[%s1720_s13 + $0x66] sm:$0x1] %vm882_vm3, %v1002_v27 }
 0x299   : > { %1037 = vrot.lane.b32.xlu0 %v1788_v49, %s1599_s16 }
 0x29a   : > { %v1024_v28 = vpop.permute.xlu1 %1023 }
 0x29b   : > { %1029 = vst.msk [vmem:[%s1720_s13 + $0x48] sm:$0x1] %vm882_vm3, %v1024_v28  ;;  %v1026_v29 = vpop.permute.xlu0 %1025 }
 0x29c   : > { %1059 = vrot.lane.b32.xlu1 %v1780_v47, %s1600_s17  ;;  %1030 = vst.msk [vmem:[%s1720_s13 + $0x68] sm:$0x1] %vm882_vm3, %v1026_v29 }
 0x29d   : > { %1061 = vrot.lane.b32.xlu0 %v1788_v49, %s1600_s17 }
 0x29e   : > { %v1048_v30 = vpop.permute.xlu1 %1047 }
 0x29f   : > { %1053 = vst.msk [vmem:[%s1720_s13 + $0x4a] sm:$0x1] %vm882_vm3, %v1048_v30  ;;  %v1050_v31 = vpop.permute.xlu0 %1049 }
 0x2a0   : > { %1083 = vrot.lane.b32.xlu1 %v1780_v47, %s1601_s18  ;;  %1054 = vst.msk [vmem:[%s1720_s13 + $0x6a] sm:$0x1] %vm882_vm3, %v1050_v31 }
 0x2a1   : > { %1085 = vrot.lane.b32.xlu0 %v1788_v49, %s1601_s18 }
 0x2a2   : > { %v1072_v32 = vpop.permute.xlu1 %1071 }
 0x2a3   : > { %1077 = vst.msk [vmem:[%s1720_s13 + $0x4c] sm:$0x1] %vm882_vm3, %v1072_v32  ;;  %v1074_v33 = vpop.permute.xlu0 %1073 }
 0x2a4   : > { %1107 = vrot.lane.b32.xlu1 %v1780_v47, %s1602_s19  ;;  %1078 = vst.msk [vmem:[%s1720_s13 + $0x6c] sm:$0x1] %vm882_vm3, %v1074_v33 }
 0x2a5   : > { %1109 = vrot.lane.b32.xlu0 %v1788_v49, %s1602_s19 }
 0x2a6   : > { %v1096_v34 = vpop.permute.xlu1 %1095 }
 0x2a7   : > { %1101 = vst.msk [vmem:[%s1720_s13 + $0x4e] sm:$0x1] %vm882_vm3, %v1096_v34  ;;  %v1098_v35 = vpop.permute.xlu0 %1097 }
 0x2a8   : > { %1219 = vrot.lane.b32.xlu1 %v1798_v52, %s1596_s30  ;;  %1102 = vst.msk [vmem:[%s1720_s13 + $0x6e] sm:$0x1] %vm882_vm3, %v1098_v35 }
 0x2a9   : > { %1221 = vrot.lane.b32.xlu0 %v1804_v53, %s1596_s30 }
 0x2aa   : > { %v1192_v36 = vpop.permute.xlu1 %1191 }
 0x2ab   : > { %1197 = vst.msk [vmem:[%s1720_s13 + $0x52] sm:$0x1] %vm882_vm3, %v1192_v36  ;;  %v1194_v37 = vpop.permute.xlu0 %1193 }
 0x2ac   : > { %1243 = vrot.lane.b32.xlu1 %v1798_v52, %s1597_s14  ;;  %1198 = vst.msk [vmem:[%s1720_s13 + $0x72] sm:$0x1] %vm882_vm3, %v1194_v37 }
 0x2ad   : > { %1245 = vrot.lane.b32.xlu0 %v1804_v53, %s1597_s14 }
 0x2ae   : > { %v1232_v38 = vpop.permute.xlu1 %1231 }
 0x2af   : > { %1237 = vst.msk [vmem:[%s1720_s13 + $0x54] sm:$0x1] %vm882_vm3, %v1232_v38  ;;  %v1234_v39 = vpop.permute.xlu0 %1233 }
 0x2b0   : > { %1267 = vrot.lane.b32.xlu1 %v1798_v52, %s1598_s15  ;;  %1238 = vst.msk [vmem:[%s1720_s13 + $0x74] sm:$0x1] %vm882_vm3, %v1234_v39 }
 0x2b1   : > { %1269 = vrot.lane.b32.xlu0 %v1804_v53, %s1598_s15 }
 0x2b2   : > { %v1256_v40 = vpop.permute.xlu1 %1255 }
 0x2b3   : > { %1261 = vst.msk [vmem:[%s1720_s13 + $0x56] sm:$0x1] %vm882_vm3, %v1256_v40  ;;  %v1258_v41 = vpop.permute.xlu0 %1257 }
 0x2b4   : > { %1291 = vrot.lane.b32.xlu1 %v1798_v52, %s1599_s16  ;;  %1262 = vst.msk [vmem:[%s1720_s13 + $0x76] sm:$0x1] %vm882_vm3, %v1258_v41 }
 0x2b5   : > { %1293 = vrot.lane.b32.xlu0 %v1804_v53, %s1599_s16 }
 0x2b6   : > { %v1280_v42 = vpop.permute.xlu1 %1279 }
 0x2b7   : > { %1285 = vst.msk [vmem:[%s1720_s13 + $0x58] sm:$0x1] %vm882_vm3, %v1280_v42  ;;  %v1282_v43 = vpop.permute.xlu0 %1281 }
 0x2b8   : > { %1315 = vrot.lane.b32.xlu1 %v1798_v52, %s1600_s17  ;;  %1286 = vst.msk [vmem:[%s1720_s13 + $0x78] sm:$0x1] %vm882_vm3, %v1282_v43 }
 0x2b9   : > { %1317 = vrot.lane.b32.xlu0 %v1804_v53, %s1600_s17 }
 0x2ba   : > { %v1304_v44 = vpop.permute.xlu1 %1303 }
 0x2bb   : > { %1309 = vst.msk [vmem:[%s1720_s13 + $0x5a] sm:$0x1] %vm882_vm3, %v1304_v44  ;;  %v1306_v45 = vpop.permute.xlu0 %1305 }
 0x2bc   : > { %1339 = vrot.lane.b32.xlu1 %v1798_v52, %s1601_s18  ;;  %1310 = vst.msk [vmem:[%s1720_s13 + $0x7a] sm:$0x1] %vm882_vm3, %v1306_v45 }
 0x2bd   : > { %1341 = vrot.lane.b32.xlu0 %v1804_v53, %s1601_s18 }
 0x2be   : > { %v1328_v46 = vpop.permute.xlu1 %1327 }
 0x2bf   : > { %1333 = vst.msk [vmem:[%s1720_s13 + $0x5c] sm:$0x1] %vm882_vm3, %v1328_v46  ;;  %v1330_v47 = vpop.permute.xlu0 %1329 }
 0x2c0   : > { %1363 = vrot.lane.b32.xlu1 %v1798_v52, %s1602_s19  ;;  %1334 = vst.msk [vmem:[%s1720_s13 + $0x7c] sm:$0x1] %vm882_vm3, %v1330_v47 }
 0x2c1   : > { %1365 = vrot.lane.b32.xlu0 %v1804_v53, %s1602_s19 }
 0x2c2   : > { %v1352_v48 = vpop.permute.xlu1 %1351 }
 0x2c3   : > { %1357 = vst.msk [vmem:[%s1720_s13 + $0x5e] sm:$0x1] %vm882_vm3, %v1352_v48  ;;  %v1354_v49 = vpop.permute.xlu0 %1353 }
 0x2c4   : > { %1358 = vst.msk [vmem:[%s1720_s13 + $0x7e] sm:$0x1] %vm882_vm3, %v1354_v49 }
 0x2c6   : > { %v960_v50 = vpop.permute.xlu1 %959 }
 0x2c7   : > { %967 = vst.msk [vmem:[%s1720_s13 + $0x3] sm:$0x1] %vm882_vm3, %v960_v50  ;;  %v962_v51 = vpop.permute.xlu0 %961 }
 0x2c8   : > { %968 = vst.msk [vmem:[%s1720_s13 + $0x23] sm:$0x1] %vm882_vm3, %v962_v51 }
 0x2ca   : > { %v984_v52 = vpop.permute.xlu1 %983 }
 0x2cb   : > { %991 = vst.msk [vmem:[%s1720_s13 + $0x5] sm:$0x1] %vm882_vm3, %v984_v52  ;;  %v986_v53 = vpop.permute.xlu0 %985 }
 0x2cc   : > { %992 = vst.msk [vmem:[%s1720_s13 + $0x25] sm:$0x1] %vm882_vm3, %v986_v53 }
 0x2ce   : > { %v1008_v54 = vpop.permute.xlu1 %1007 }
 0x2cf   : > { %1015 = vst.msk [vmem:[%s1720_s13 + $0x7] sm:$0x1] %vm882_vm3, %v1008_v54  ;;  %v1010_v55 = vpop.permute.xlu0 %1009 }
 0x2d0   : > { %1016 = vst.msk [vmem:[%s1720_s13 + $0x27] sm:$0x1] %vm882_vm3, %v1010_v55 }
 0x2d2   : > { %v1032_v56 = vpop.permute.xlu1 %1031 }
 0x2d3   : > { %1039 = vst.msk [vmem:[%s1720_s13 + $0x9] sm:$0x1] %vm882_vm3, %v1032_v56  ;;  %v1034_v57 = vpop.permute.xlu0 %1033 }
 0x2d4   : > { %1040 = vst.msk [vmem:[%s1720_s13 + $0x29] sm:$0x1] %vm882_vm3, %v1034_v57 }
 0x2d6   : > { %v1056_v58 = vpop.permute.xlu1 %1055 }
 0x2d7   : > { %1063 = vst.msk [vmem:[%s1720_s13 + $0xb] sm:$0x1] %vm882_vm3, %v1056_v58  ;;  %v1058_v59 = vpop.permute.xlu0 %1057 }
 0x2d8   : > { %1064 = vst.msk [vmem:[%s1720_s13 + $0x2b] sm:$0x1] %vm882_vm3, %v1058_v59 }
 0x2da   : > { %v1080_v60 = vpop.permute.xlu1 %1079 }
 0x2db   : > { %1087 = vst.msk [vmem:[%s1720_s13 + $0xd] sm:$0x1] %vm882_vm3, %v1080_v60  ;;  %v1082_v61 = vpop.permute.xlu0 %1081 }
 0x2dc   : > { %1088 = vst.msk [vmem:[%s1720_s13 + $0x2d] sm:$0x1] %vm882_vm3, %v1082_v61 }
 0x2de   : > { %v1104_v62 = vpop.permute.xlu1 %1103 }
 0x2df   : > { %1111 = vst.msk [vmem:[%s1720_s13 + $0xf] sm:$0x1] %vm882_vm3, %v1104_v62  ;;  %v1106_v63 = vpop.permute.xlu0 %1105 }
 0x2e0   : > { %1112 = vst.msk [vmem:[%s1720_s13 + $0x2f] sm:$0x1] %vm882_vm3, %v1106_v63 }
 0x2e2   : > { %v1216_v0 = vpop.permute.xlu1 %1215 }
 0x2e3   : > { %1223 = vst.msk [vmem:[%s1720_s13 + $0x13] sm:$0x1] %vm882_vm3, %v1216_v0  ;;  %v1218_v1 = vpop.permute.xlu0 %1217 }
 0x2e4   : > { %1224 = vst.msk [vmem:[%s1720_s13 + $0x33] sm:$0x1] %vm882_vm3, %v1218_v1 }
 0x2e6   : > { %v1240_v2 = vpop.permute.xlu1 %1239 }
 0x2e7   : > { %1247 = vst.msk [vmem:[%s1720_s13 + $0x15] sm:$0x1] %vm882_vm3, %v1240_v2  ;;  %v1242_v3 = vpop.permute.xlu0 %1241 }
 0x2e8   : > { %1248 = vst.msk [vmem:[%s1720_s13 + $0x35] sm:$0x1] %vm882_vm3, %v1242_v3 }
 0x2ea   : > { %v1264_v4 = vpop.permute.xlu1 %1263 }
 0x2eb   : > { %1271 = vst.msk [vmem:[%s1720_s13 + $0x17] sm:$0x1] %vm882_vm3, %v1264_v4  ;;  %v1266_v5 = vpop.permute.xlu0 %1265 }
 0x2ec   : > { %1272 = vst.msk [vmem:[%s1720_s13 + $0x37] sm:$0x1] %vm882_vm3, %v1266_v5 }
 0x2ee   : > { %v1288_v6 = vpop.permute.xlu1 %1287 }
 0x2ef   : > { %1295 = vst.msk [vmem:[%s1720_s13 + $0x19] sm:$0x1] %vm882_vm3, %v1288_v6  ;;  %v1290_v7 = vpop.permute.xlu0 %1289 }
 0x2f0   : > { %1296 = vst.msk [vmem:[%s1720_s13 + $0x39] sm:$0x1] %vm882_vm3, %v1290_v7 }
 0x2f2   : > { %v1312_v8 = vpop.permute.xlu1 %1311 }
 0x2f3   : > { %1319 = vst.msk [vmem:[%s1720_s13 + $0x1b] sm:$0x1] %vm882_vm3, %v1312_v8  ;;  %v1314_v9 = vpop.permute.xlu0 %1313 }
 0x2f4   : > { %1320 = vst.msk [vmem:[%s1720_s13 + $0x3b] sm:$0x1] %vm882_vm3, %v1314_v9 }
 0x2f6   : > { %v1336_v10 = vpop.permute.xlu1 %1335 }
 0x2f7   : > { %1343 = vst.msk [vmem:[%s1720_s13 + $0x1d] sm:$0x1] %vm882_vm3, %v1336_v10  ;;  %v1338_v11 = vpop.permute.xlu0 %1337 }
 0x2f8   : > { %1344 = vst.msk [vmem:[%s1720_s13 + $0x3d] sm:$0x1] %vm882_vm3, %v1338_v11 }
 0x2fa   : > { %v1360_v12 = vpop.permute.xlu1 %1359 }
 0x2fb   : > { %1367 = vst.msk [vmem:[%s1720_s13 + $0x1f] sm:$0x1] %vm882_vm3, %v1360_v12  ;;  %v1362_v13 = vpop.permute.xlu0 %1361 }
 0x2fc   : > { %1368 = vst.msk [vmem:[%s1720_s13 + $0x3f] sm:$0x1] %vm882_vm3, %v1362_v13 }
 0x2fe   : > { %v964_v14 = vpop.permute.xlu1 %963 }
 0x2ff   : > { %969 = vst.msk [vmem:[%s1720_s13 + $0x43] sm:$0x1] %vm882_vm3, %v964_v14  ;;  %v966_v15 = vpop.permute.xlu0 %965 }
 0x300   : > { %970 = vst.msk [vmem:[%s1720_s13 + $0x63] sm:$0x1] %vm882_vm3, %v966_v15 }
 0x302   : > { %v988_v16 = vpop.permute.xlu1 %987 }
 0x303   : > { %993 = vst.msk [vmem:[%s1720_s13 + $0x45] sm:$0x1] %vm882_vm3, %v988_v16  ;;  %v990_v17 = vpop.permute.xlu0 %989 }
 0x304   : > { %994 = vst.msk [vmem:[%s1720_s13 + $0x65] sm:$0x1] %vm882_vm3, %v990_v17 }
 0x306   : > { %v1012_v18 = vpop.permute.xlu1 %1011 }
 0x307   : > { %1017 = vst.msk [vmem:[%s1720_s13 + $0x47] sm:$0x1] %vm882_vm3, %v1012_v18  ;;  %v1014_v19 = vpop.permute.xlu0 %1013 }
 0x308   : > { %1018 = vst.msk [vmem:[%s1720_s13 + $0x67] sm:$0x1] %vm882_vm3, %v1014_v19 }
 0x30a   : > { %v1036_v20 = vpop.permute.xlu1 %1035 }
 0x30b   : > { %1041 = vst.msk [vmem:[%s1720_s13 + $0x49] sm:$0x1] %vm882_vm3, %v1036_v20  ;;  %v1038_v21 = vpop.permute.xlu0 %1037 }
 0x30c   : > { %1042 = vst.msk [vmem:[%s1720_s13 + $0x69] sm:$0x1] %vm882_vm3, %v1038_v21 }
 0x30e   : > { %v1060_v22 = vpop.permute.xlu1 %1059 }
 0x30f   : > { %1065 = vst.msk [vmem:[%s1720_s13 + $0x4b] sm:$0x1] %vm882_vm3, %v1060_v22  ;;  %v1062_v23 = vpop.permute.xlu0 %1061 }
 0x310   : > { %1066 = vst.msk [vmem:[%s1720_s13 + $0x6b] sm:$0x1] %vm882_vm3, %v1062_v23 }
 0x312   : > { %v1084_v24 = vpop.permute.xlu1 %1083 }
 0x313   : > { %1089 = vst.msk [vmem:[%s1720_s13 + $0x4d] sm:$0x1] %vm882_vm3, %v1084_v24  ;;  %v1086_v25 = vpop.permute.xlu0 %1085 }
 0x314   : > { %1090 = vst.msk [vmem:[%s1720_s13 + $0x6d] sm:$0x1] %vm882_vm3, %v1086_v25 }
 0x316   : > { %v1108_v26 = vpop.permute.xlu1 %1107 }
 0x317   : > { %1113 = vst.msk [vmem:[%s1720_s13 + $0x4f] sm:$0x1] %vm882_vm3, %v1108_v26  ;;  %v1110_v27 = vpop.permute.xlu0 %1109 }
 0x318   : > { %1114 = vst.msk [vmem:[%s1720_s13 + $0x6f] sm:$0x1] %vm882_vm3, %v1110_v27 }
 0x31a   : > { %v1220_v28 = vpop.permute.xlu1 %1219 }
 0x31b   : > { %1225 = vst.msk [vmem:[%s1720_s13 + $0x53] sm:$0x1] %vm882_vm3, %v1220_v28  ;;  %v1222_v29 = vpop.permute.xlu0 %1221 }
 0x31c   : > { %1226 = vst.msk [vmem:[%s1720_s13 + $0x73] sm:$0x1] %vm882_vm3, %v1222_v29 }
 0x31e   : > { %v1244_v30 = vpop.permute.xlu1 %1243 }
 0x31f   : > { %1249 = vst.msk [vmem:[%s1720_s13 + $0x55] sm:$0x1] %vm882_vm3, %v1244_v30  ;;  %v1246_v31 = vpop.permute.xlu0 %1245 }
 0x320   : > { %1250 = vst.msk [vmem:[%s1720_s13 + $0x75] sm:$0x1] %vm882_vm3, %v1246_v31 }
 0x322   : > { %v1268_v32 = vpop.permute.xlu1 %1267 }
 0x323   : > { %1273 = vst.msk [vmem:[%s1720_s13 + $0x57] sm:$0x1] %vm882_vm3, %v1268_v32  ;;  %v1270_v33 = vpop.permute.xlu0 %1269 }
 0x324   : > { %1274 = vst.msk [vmem:[%s1720_s13 + $0x77] sm:$0x1] %vm882_vm3, %v1270_v33 }
 0x326   : > { %v1292_v34 = vpop.permute.xlu1 %1291 }
 0x327   : > { %1297 = vst.msk [vmem:[%s1720_s13 + $0x59] sm:$0x1] %vm882_vm3, %v1292_v34  ;;  %v1294_v35 = vpop.permute.xlu0 %1293 }
 0x328   : > { %1298 = vst.msk [vmem:[%s1720_s13 + $0x79] sm:$0x1] %vm882_vm3, %v1294_v35 }
 0x32a   : > { %v1316_v36 = vpop.permute.xlu1 %1315 }
 0x32b   : > { %1321 = vst.msk [vmem:[%s1720_s13 + $0x5b] sm:$0x1] %vm882_vm3, %v1316_v36  ;;  %v1318_v37 = vpop.permute.xlu0 %1317 }
 0x32c   : > { %1322 = vst.msk [vmem:[%s1720_s13 + $0x7b] sm:$0x1] %vm882_vm3, %v1318_v37 }
 0x32e   : > { %v1340_v38 = vpop.permute.xlu1 %1339 }
 0x32f   : > { %1345 = vst.msk [vmem:[%s1720_s13 + $0x5d] sm:$0x1] %vm882_vm3, %v1340_v38  ;;  %v1342_v39 = vpop.permute.xlu0 %1341 }
 0x330   : > { %1346 = vst.msk [vmem:[%s1720_s13 + $0x7d] sm:$0x1] %vm882_vm3, %v1342_v39 }
 0x332   : > { %v1364_v40 = vpop.permute.xlu1 %1363 }
 0x333   : > { %1369 = vst.msk [vmem:[%s1720_s13 + $0x5f] sm:$0x1] %vm882_vm3, %v1364_v40  ;;  %v1366_v41 = vpop.permute.xlu0 %1365 }
 0x334   : > { %1370 = vst.msk [vmem:[%s1720_s13 + $0x7f] sm:$0x1] %vm882_vm3, %v1366_v41 }
 0x335 PF: > { %s19_s11 = sadd.s32 1, %s1591_s11   ;;  %s2235_s30 = smov %s1587_s10 }
 0x336   : > { %p16_p5 = scmp.ge.s32.totalorder %s19_s11, 4   ;;  %s2236_s10 = smov %s2238_s12 }
 0x338   :  { %18 = sbr.rel (!%p16_p5) target bundleno = 2 (0x2), region = 92 }

</bundles_post_ra>
